<compile_context>
chip_gen: v5e
topology: v5e:2x2
jax: 0.10.0
libtpu: 0.0.40
codegen_flags: <defaults>
</compile_context>

<pallas_src>
import math

import jax
import jax.numpy as jnp
from jax.experimental import pallas as pl
from jax.experimental.pallas import tpu as pltpu


# ----------------------------------------------------------------------------
# Fused Pallas kernel: encoder (l==0) -> matching-prop layer (every l) -> aggregator (l==L-1)
# ----------------------------------------------------------------------------
def fused_gmn_kernel(
    nf_ref, ef_ref, g_ref, nb_ref, gg_ref,                      # graph data (resident)
    wn_ref, bn_ref, we_ref, be_ref,                             # encoder weights (resident)
    w1g_ref, b1g_ref, w1v_ref, b1v_ref,                         # aggregator gate/value (resident)
    wt1_ref, bt1_ref, wt2_ref, bt2_ref,                         # graph-transform MLP (resident)
    W1_ref, B1_ref, w2_ref, b2_ref, rw2_ref, rb2_ref,           # per-layer message MLP (stacked)
    uw1_ref, ub1_ref, uw2_ref, ub2_ref, uw3_ref, ub3_ref,       # per-layer node-update MLP
    out_ref,                                                    # [n_graphs, GR]
    h_scr, e_scr,                                               # VMEM carries across grid steps
):
    f32, bf16 = jnp.float32, jnp.bfloat16
    l = pl.program_id(0)
    last = pl.num_programs(0) - 1

    E2 = g_ref.shape[0]
    E = E2 // 2
    H = W1_ref.shape[-1] // 2

    # ---- encoder (once, at the first grid step) --------------------------------------------
    @pl.when(l == 0)
    def _():
        h_scr[...] = jnp.dot(nf_ref[...], wn_ref[...], preferred_element_type=f32) + bn_ref[...]
        e_scr[...] = jnp.dot(ef_ref[...], we_ref[...], preferred_element_type=f32) + be_ref[...]

    # ---- one GraphPropMatchingLayer ----------------------------------------------------------
    h = h_scr[...]                               # [N, D] f32 carry
    hb = h.astype(bf16)
    G = g_ref[...]                               # [2E, N] bf16 one-hot [from_idx; to_idx]

    # fused endpoint gather: rows 0:E = h[from_idx], rows E:2E = h[to_idx]
    both = jnp.dot(G, hb, preferred_element_type=f32)            # [2E, D]
    x_fwd = jnp.concatenate([both[:E], both[E:], e_scr[...]], axis=-1)   # [E, 2D+De]

    # fused forward+reverse first MLP layer (reverse weights were row-permuted at prep time)
    z = jnp.maximum(
        jnp.dot(x_fwd.astype(bf16), W1_ref[...], preferred_element_type=f32) + B1_ref[...], 0.0)
    msg = jnp.dot(z[:, :H].astype(bf16), w2_ref[...], preferred_element_type=f32) + b2_ref[...]
    msgr = jnp.dot(z[:, H:].astype(bf16), rw2_ref[...], preferred_element_type=f32) + rb2_ref[...]

    # fused scatter-sum: contract the edge axis of the SAME table G=[gf;gt] against [msgr;msg]
    #   = segment_sum(msg -> to_idx) + segment_sum(msgr -> from_idx)
    msg_cat = jnp.concatenate([msgr, msg], axis=0).astype(bf16)   # [2E, 2D]
    agg = jax.lax.dot_general(G, msg_cat, (((0,), (0,)), ((), ())),
                              preferred_element_type=f32)         # [N, 2D]

    # cross-graph attention (dot-product similarity, additive -1e9 bias for non-partner nodes)
    sim = jax.lax.dot_general(hb, hb, (((1,), (1,)), ((), ())),
                              preferred_element_type=f32) + nb_ref[...]    # [N, N]
    p = jnp.exp(sim - jnp.max(sim, axis=-1, keepdims=True))
    denom = jnp.sum(p, axis=-1, keepdims=True)     # >= 1: row-max entry contributes exp(0)
    att = jnp.dot(p.astype(bf16), hb, preferred_element_type=f32) * pl.reciprocal(denom, approx=True)
    att_in = h - att

    # residual node-update MLP on concat([aggregated_messages, attention_input, node_states])
    u_in = jnp.concatenate([agg, att_in, h], axis=-1).astype(bf16)          # [N, 4D]
    u = jnp.maximum(jnp.dot(u_in, uw1_ref[...], preferred_element_type=f32) + ub1_ref[...], 0.0)
    u = jnp.maximum(jnp.dot(u.astype(bf16), uw2_ref[...],
                            preferred_element_type=f32) + ub2_ref[...], 0.0)
    u = jnp.dot(u.astype(bf16), uw3_ref[...], preferred_element_type=f32) + ub3_ref[...]
    h_new = h + u
    h_scr[...] = h_new

    # ---- gated aggregator + graph transform (once, at the last grid step) -------------------
    @pl.when(l == last)
    def _():
        hf = h_new.astype(bf16)
        gates = jax.nn.sigmoid(jnp.dot(hf, w1g_ref[...],
                                       preferred_element_type=f32) + b1g_ref[...])
        vals = (jnp.dot(hf, w1v_ref[...], preferred_element_type=f32) + b1v_ref[...]) * gates
        g = jnp.dot(gg_ref[...], vals.astype(bf16), preferred_element_type=f32)  # per-graph sum
        g = jnp.maximum(jnp.dot(g.astype(bf16), wt1_ref[...],
                                preferred_element_type=f32) + bt1_ref[...], 0.0)
        out_ref[...] = jnp.dot(g.astype(bf16), wt2_ref[...],
                               preferred_element_type=f32) + bt2_ref[...]


# ----------------------------------------------------------------------------
# pallas_call wrapper
# ----------------------------------------------------------------------------
def _resident_spec(x):
    # same block every layer -> fetched once, stays VMEM-resident across the whole grid
    nd = x.ndim
    return pl.BlockSpec(x.shape, lambda l, nd=nd: (0,) * nd)


def _per_layer_spec(x):
    # select layer l's slice; leading (layer) axis squeezed away inside the kernel
    nd = x.ndim
    return pl.BlockSpec((None,) + tuple(x.shape[1:]), lambda l, nd=nd: (l,) + (0,) * (nd - 1))


def _vmem_limit_bytes():
    # generation-aware: ~96 MiB on v5e/v6e (128 MiB phys), ~48 MiB on v7x (64 MiB phys)
    try:
        cap = getattr(pltpu.get_tpu_info(), "vmem_capacity_bytes", None)
        if cap:
            return int(min(cap * 3 // 4, 100 * 1024 * 1024))
    except Exception:
        pass
    return 48 * 1024 * 1024


def prepare_params(params):
    """One-time parameter preprocessing (hoisted out of the forward): stack per-layer weights on a
    leading layer axis, fuse forward/reverse first message-MLP layers, pre-cast weights to bf16."""
    bf16, f32 = jnp.bfloat16, jnp.float32
    enc = params['encoder']
    D = enc['wn'].shape[1]
    GR = params['agg']['mlp2'][-1][0].shape[1]

    out = {
        'wn': enc['wn'].astype(bf16), 'bn': enc['bn'].astype(f32),
        'we': enc['we'].astype(bf16), 'be': enc['be'].astype(f32),
    }
    (w1a, b1a), = params['agg']['mlp1']
    out['w1g'] = w1a[:, :GR].astype(bf16); out['b1g'] = b1a[:, :GR].astype(f32)
    out['w1v'] = w1a[:, GR:].astype(bf16); out['b1v'] = b1a[:, GR:].astype(f32)
    (wt1, bt1), (wt2, bt2) = params['agg']['mlp2']
    out['wt1'] = wt1.astype(bf16); out['bt1'] = bt1.astype(f32)
    out['wt2'] = wt2.astype(bf16); out['bt2'] = bt2.astype(f32)

    def stk(fn, dt):
        return jnp.stack([fn(lp) for lp in params['prop_layers']], axis=0).astype(dt)

    def fuse_w1(lp):
        w1 = lp['msg'][0][0]                        # [2D+De, H]
        rw1 = lp['rmsg'][0][0]
        # reverse input [to, from, e] is a column permutation of [from, to, e] -> permute rows
        rw1_perm = jnp.concatenate([rw1[D:2 * D], rw1[:D], rw1[2 * D:]], axis=0)
        return jnp.concatenate([w1, rw1_perm], axis=1)              # [2D+De, 2H]

    out['W1'] = stk(fuse_w1, bf16)
    out['B1'] = stk(lambda lp: jnp.concatenate([lp['msg'][0][1], lp['rmsg'][0][1]], axis=1), f32)
    out['w2'] = stk(lambda lp: lp['msg'][1][0], bf16);   out['b2'] = stk(lambda lp: lp['msg'][1][1], f32)
    out['rw2'] = stk(lambda lp: lp['rmsg'][1][0], bf16); out['rb2'] = stk(lambda lp: lp['rmsg'][1][1], f32)
    out['uw1'] = stk(lambda lp: lp['update'][0][0], bf16); out['ub1'] = stk(lambda lp: lp['update'][0][1], f32)
    out['uw2'] = stk(lambda lp: lp['update'][1][0], bf16); out['ub2'] = stk(lambda lp: lp['update'][1][1], f32)
    out['uw3'] = stk(lambda lp: lp['update'][2][0], bf16); out['ub3'] = stk(lambda lp: lp['update'][2][1], f32)
    return out


def tree_matching_net_forward(prepped, node_features, edge_features, from_idx, to_idx,
                              graph_idx, n_graphs):
    bf16, f32 = jnp.bfloat16, jnp.float32
    N = node_features.shape[0]
    E = edge_features.shape[0]
    D = prepped['wn'].shape[1]
    De = prepped['we'].shape[1]
    GR = prepped['wt2'].shape[1]
    L = prepped['W1'].shape[0]

    # single [2E, N] gather/scatter table: rows 0:E = one_hot(from_idx), rows E:2E = one_hot(to_idx)
    G = jnp.concatenate([jax.nn.one_hot(from_idx, N, dtype=bf16),
                         jax.nn.one_hot(to_idx, N, dtype=bf16)], axis=0)
    # additive attention bias (graphs paired (0,1), (2,3), ... like the reference)
    partner = graph_idx ^ 1
    neg_bias = jnp.where(graph_idx[None, :] == partner[:, None], 0.0, -1e9).astype(f32)
    gg = jax.nn.one_hot(graph_idx, n_graphs, dtype=bf16).T        # [n_graphs, N]

    resident = (node_features.astype(bf16), edge_features.astype(bf16), G, neg_bias, gg,
                prepped['wn'], prepped['bn'], prepped['we'], prepped['be'],
                prepped['w1g'], prepped['b1g'], prepped['w1v'], prepped['b1v'],
                prepped['wt1'], prepped['bt1'], prepped['wt2'], prepped['bt2'])
    per_layer = (prepped['W1'], prepped['B1'], prepped['w2'], prepped['b2'],
                 prepped['rw2'], prepped['rb2'],
                 prepped['uw1'], prepped['ub1'], prepped['uw2'], prepped['ub2'],
                 prepped['uw3'], prepped['ub3'])

    return pl.pallas_call(
        fused_gmn_kernel,
        grid=(L,),
        out_shape=jax.ShapeDtypeStruct((n_graphs, GR), f32),
        in_specs=[_resident_spec(x) for x in resident] + [_per_layer_spec(x) for x in per_layer],
        out_specs=pl.BlockSpec((n_graphs, GR), lambda l: (0, 0)),
        scratch_shapes=[pltpu.VMEM((N, D), f32),      # node-state carry across layers
                        pltpu.VMEM((E, De), f32)],    # encoded edge states (computed at l==0)
        compiler_params=pltpu.CompilerParams(
            dimension_semantics=("arbitrary",),       # layers are sequential
            vmem_limit_bytes=_vmem_limit_bytes()),
    )(*resident, *per_layer)


# ----------------------------------------------------------------------------
# Deterministic parameter init (synthetic; shapes follow the module __init__)
# ----------------------------------------------------------------------------
def _init_linear(key, fan_in, fan_out):
    kw, kb = jax.random.split(key)
    bound = 1.0 / math.sqrt(fan_in)
    w = jax.random.uniform(kw, (fan_in, fan_out), jnp.float32, -bound, bound)
    b = jax.random.uniform(kb, (1, fan_out), jnp.float32, -bound, bound)
    return w, b


def _init_mlp(key, sizes):
    keys = jax.random.split(key, len(sizes) - 1)
    return [_init_linear(k, sizes[i], sizes[i + 1]) for i, k in enumerate(keys)]


def init_params(key, cfg):
    NF, EF = cfg['node_feature_dim'], cfg['edge_feature_dim']
    D, De = cfg['node_state_dim'], cfg['edge_state_dim']
    GR = cfg['graph_rep_dim']
    eh = list(cfg['edge_hidden_sizes']) + [2 * D]        # module appends node_state_dim * 2
    nh = list(cfg['node_hidden_sizes']) + [2 * D] + [D]  # module appends 2*D; prop layer appends D
    gts = list(cfg['graph_transform_sizes']) + [GR]      # module appends graph_rep_dim
    keys = jax.random.split(key, 3 + cfg['n_prop_layers'])

    encoder = {}
    encoder['wn'], encoder['bn'] = _init_linear(keys[0], NF, D)
    encoder['we'], encoder['be'] = _init_linear(keys[1], EF, De)

    prop_layers = []
    for l in range(cfg['n_prop_layers']):          # share_prop_params=False -> per-layer params
        k1, k2, k3 = jax.random.split(keys[2 + l], 3)
        prop_layers.append({
            'msg': _init_mlp(k1, [2 * D + De] + eh),
            'rmsg': _init_mlp(k2, [2 * D + De] + eh),   # reverse_dir_param_different=True
            'update': _init_mlp(k3, [4 * D] + nh),      # prop_type='matching' -> 4*D input
        })

    kagg1, kagg2 = jax.random.split(keys[2 + cfg['n_prop_layers']], 2)
    agg = {
        'mlp1': _init_mlp(kagg1, [D, 2 * GR]),          # gated=True -> output 2*graph_rep_dim
        'mlp2': _init_mlp(kagg2, [GR] + gts),
    }
    return {'encoder': encoder, 'prop_layers': prop_layers, 'agg': agg}


# ----------------------------------------------------------------------------
# Pure-JAX f32 reference (mirrors the PyTorch GMN forward) for a numerical check
# ----------------------------------------------------------------------------
def _mlp(x, layers):
    for i, (w, b) in enumerate(layers):
        x = x @ w + b
        if i < len(layers) - 1:
            x = jax.nn.relu(x)
    return x


def reference_forward(params, node_features, edge_features, from_idx, to_idx, graph_idx,
                      n_graphs, graph_rep_dim):
    enc = params['encoder']
    h = node_features @ enc['wn'] + enc['bn']
    e = edge_features @ enc['we'] + enc['be']
    N = h.shape[0]
    for lp in params['prop_layers']:
        msg = _mlp(jnp.concatenate([h[from_idx], h[to_idx], e], axis=-1), lp['msg'])
        agg = jax.ops.segment_sum(msg, to_idx, num_segments=N)
        msgr = _mlp(jnp.concatenate([h[to_idx], h[from_idx], e], axis=-1), lp['rmsg'])
        agg = agg + jax.ops.segment_sum(msgr, from_idx, num_segments=N)
        atts = []
        for g in range(0, n_graphs, 2):
            x = h[graph_idx == g]
            y = h[graph_idx == g + 1]
            a = x @ y.T
            atts.append(jax.nn.softmax(a, axis=1) @ y)
            atts.append(jax.nn.softmax(a, axis=0).T @ x)
        att_in = h - jnp.concatenate(atts, axis=0)
        h = h + _mlp(jnp.concatenate([agg, att_in, h], axis=-1), lp['update'])
    ag = params['agg']
    x = _mlp(h, ag['mlp1'])
    GR = graph_rep_dim
    gated = x[:, GR:] * jax.nn.sigmoid(x[:, :GR])
    g = jax.ops.segment_sum(gated, graph_idx, num_segments=n_graphs)
    return _mlp(g, ag['mlp2'])


# ----------------------------------------------------------------------------
if __name__ == "__main__":
    cfg = dict(
        node_feature_dim=16,
        edge_feature_dim=8,
        node_state_dim=32,
        edge_state_dim=16,
        node_hidden_sizes=[64],
        edge_hidden_sizes=[64],
        graph_rep_dim=64,
        graph_transform_sizes=[64],
        n_prop_layers=2,
    )

    key = jax.random.PRNGKey(0)
    kn, ke, kf, kt = jax.random.split(key, 4)
    n_graphs = 4                # two graph pairs
    nodes_per_graph = 8
    edges_per_graph = 12
    N = n_graphs * nodes_per_graph
    E = n_graphs * edges_per_graph

    node_features = jax.random.normal(kn, (N, cfg['node_feature_dim']), jnp.float32)
    edge_features = jax.random.normal(ke, (E, cfg['edge_feature_dim']), jnp.float32)
    offsets = jnp.repeat(jnp.arange(n_graphs, dtype=jnp.int32) * nodes_per_graph, edges_per_graph)
    from_idx = jax.random.randint(kf, (E,), 0, nodes_per_graph, dtype=jnp.int32) + offsets
    to_idx = jax.random.randint(kt, (E,), 0, nodes_per_graph, dtype=jnp.int32) + offsets
    graph_idx = jnp.repeat(jnp.arange(n_graphs, dtype=jnp.int32), nodes_per_graph)

    params = init_params(jax.random.PRNGKey(42), cfg)
    # one-time preprocessing: per-layer weight stacking, fwd/rev first-layer fusion, bf16 cast
    prepped = prepare_params(params)

    forward = jax.jit(tree_matching_net_forward, static_argnames=('n_graphs',))
    out = forward(prepped, node_features, edge_features, from_idx, to_idx, graph_idx,
                  n_graphs=n_graphs)
    out = jax.block_until_ready(out)
    assert out.shape == (n_graphs, cfg['graph_rep_dim'])

    ref = reference_forward(params, node_features, edge_features, from_idx, to_idx, graph_idx,
                            n_graphs, cfg['graph_rep_dim'])
    err = float(jnp.max(jnp.abs(out - ref)) / (jnp.max(jnp.abs(ref)) + 1e-6))
    # bf16 matmul inputs with f32 accumulation vs an all-f32 reference -> loose-ish tolerance.
    if not (err < 5e-2):
        raise AssertionError(f"Pallas output mismatch vs reference, rel err = {err}")
    print("KERNEL_OK")
</pallas_src>

<mosaic_0001>
module attributes {stable_mosaic.version = 11 : i64} {
  func.func @fused_gmn_kernel(%arg0: i32, %arg1: memref<32x16xbf16, #tpu.memory_space<vmem>>, %arg2: memref<48x8xbf16, #tpu.memory_space<vmem>>, %arg3: memref<96x32xbf16, #tpu.memory_space<vmem>>, %arg4: memref<32x32xf32, #tpu.memory_space<vmem>>, %arg5: memref<4x32xbf16, #tpu.memory_space<vmem>>, %arg6: memref<16x32xbf16, #tpu.memory_space<vmem>>, %arg7: memref<1x32xf32, #tpu.memory_space<vmem>>, %arg8: memref<8x16xbf16, #tpu.memory_space<vmem>>, %arg9: memref<1x16xf32, #tpu.memory_space<vmem>>, %arg10: memref<32x64xbf16, #tpu.memory_space<vmem>>, %arg11: memref<1x64xf32, #tpu.memory_space<vmem>>, %arg12: memref<32x64xbf16, #tpu.memory_space<vmem>>, %arg13: memref<1x64xf32, #tpu.memory_space<vmem>>, %arg14: memref<64x64xbf16, #tpu.memory_space<vmem>>, %arg15: memref<1x64xf32, #tpu.memory_space<vmem>>, %arg16: memref<64x64xbf16, #tpu.memory_space<vmem>>, %arg17: memref<1x64xf32, #tpu.memory_space<vmem>>, %arg18: memref<1x80x128xbf16, #tpu.memory_space<vmem>>, %arg19: memref<1x1x128xf32, #tpu.memory_space<vmem>>, %arg20: memref<1x64x64xbf16, #tpu.memory_space<vmem>>, %arg21: memref<1x1x64xf32, #tpu.memory_space<vmem>>, %arg22: memref<1x64x64xbf16, #tpu.memory_space<vmem>>, %arg23: memref<1x1x64xf32, #tpu.memory_space<vmem>>, %arg24: memref<1x128x64xbf16, #tpu.memory_space<vmem>>, %arg25: memref<1x1x64xf32, #tpu.memory_space<vmem>>, %arg26: memref<1x64x64xbf16, #tpu.memory_space<vmem>>, %arg27: memref<1x1x64xf32, #tpu.memory_space<vmem>>, %arg28: memref<1x64x32xbf16, #tpu.memory_space<vmem>>, %arg29: memref<1x1x32xf32, #tpu.memory_space<vmem>>, %arg30: memref<4x64xf32, #tpu.memory_space<vmem>>, %arg31: memref<32x32xf32, #tpu.memory_space<vmem>>, %arg32: memref<48x16xf32, #tpu.memory_space<vmem>>) attributes {dimension_semantics = [#tpu.dimension_semantics<arbitrary>], iteration_bounds = array<i64: 2>, scalar_prefetch = 0 : i64, scratch_operands = 2 : i64, tpu.core_type = #tpu.core_type<tc>, window_params = [{pipeline_mode = #tpu.pipeline_mode<synchronous>, transform_indices = @transform_0, window_bounds = array<i64: 32, 16>}, {pipeline_mode = #tpu.pipeline_mode<synchronous>, transform_indices = @transform_1, window_bounds = array<i64: 48, 8>}, {pipeline_mode = #tpu.pipeline_mode<synchronous>, transform_indices = @transform_2, window_bounds = array<i64: 96, 32>}, {pipeline_mode = #tpu.pipeline_mode<synchronous>, transform_indices = @transform_3, window_bounds = array<i64: 32, 32>}, {pipeline_mode = #tpu.pipeline_mode<synchronous>, transform_indices = @transform_4, window_bounds = array<i64: 4, 32>}, {pipeline_mode = #tpu.pipeline_mode<synchronous>, transform_indices = @transform_5, window_bounds = array<i64: 16, 32>}, {pipeline_mode = #tpu.pipeline_mode<synchronous>, transform_indices = @transform_6, window_bounds = array<i64: 1, 32>}, {pipeline_mode = #tpu.pipeline_mode<synchronous>, transform_indices = @transform_7, window_bounds = array<i64: 8, 16>}, {pipeline_mode = #tpu.pipeline_mode<synchronous>, transform_indices = @transform_8, window_bounds = array<i64: 1, 16>}, {pipeline_mode = #tpu.pipeline_mode<synchronous>, transform_indices = @transform_9, window_bounds = array<i64: 32, 64>}, {pipeline_mode = #tpu.pipeline_mode<synchronous>, transform_indices = @transform_10, window_bounds = array<i64: 1, 64>}, {pipeline_mode = #tpu.pipeline_mode<synchronous>, transform_indices = @transform_11, window_bounds = array<i64: 32, 64>}, {pipeline_mode = #tpu.pipeline_mode<synchronous>, transform_indices = @transform_12, window_bounds = array<i64: 1, 64>}, {pipeline_mode = #tpu.pipeline_mode<synchronous>, transform_indices = @transform_13, window_bounds = array<i64: 64, 64>}, {pipeline_mode = #tpu.pipeline_mode<synchronous>, transform_indices = @transform_14, window_bounds = array<i64: 1, 64>}, {pipeline_mode = #tpu.pipeline_mode<synchronous>, transform_indices = @transform_15, window_bounds = array<i64: 64, 64>}, {pipeline_mode = #tpu.pipeline_mode<synchronous>, transform_indices = @transform_16, window_bounds = array<i64: 1, 64>}, {transform_indices = @transform_17, window_bounds = array<i64: 1, 80, 128>}, {transform_indices = @transform_18, window_bounds = array<i64: 1, 1, 128>}, {transform_indices = @transform_19, window_bounds = array<i64: 1, 64, 64>}, {transform_indices = @transform_20, window_bounds = array<i64: 1, 1, 64>}, {transform_indices = @transform_21, window_bounds = array<i64: 1, 64, 64>}, {transform_indices = @transform_22, window_bounds = array<i64: 1, 1, 64>}, {transform_indices = @transform_23, window_bounds = array<i64: 1, 128, 64>}, {transform_indices = @transform_24, window_bounds = array<i64: 1, 1, 64>}, {transform_indices = @transform_25, window_bounds = array<i64: 1, 64, 64>}, {transform_indices = @transform_26, window_bounds = array<i64: 1, 1, 64>}, {transform_indices = @transform_27, window_bounds = array<i64: 1, 64, 32>}, {transform_indices = @transform_28, window_bounds = array<i64: 1, 1, 32>}, {pipeline_mode = #tpu.pipeline_mode<synchronous>, transform_indices = @transform_29, window_bounds = array<i64: 4, 64>}]} {
    %c0_i32 = arith.constant 0 : i32
    %0 = arith.cmpi eq, %arg0, %c0_i32 : i32
    %1 = arith.extui %0 : i1 to i32
    %c0_i32_0 = arith.constant 0 : i32
    %2 = arith.cmpi ne, %1, %c0_i32_0 : i32
    scf.if %2 {
      %c0_61 = arith.constant 0 : index
      %c0_62 = arith.constant 0 : index
      %92 = vector.load %arg1[%c0_61, %c0_62] : memref<32x16xbf16, #tpu.memory_space<vmem>>, vector<32x16xbf16>
      %c0_63 = arith.constant 0 : index
      %c0_64 = arith.constant 0 : index
      %93 = vector.load %arg6[%c0_63, %c0_64] : memref<16x32xbf16, #tpu.memory_space<vmem>>, vector<16x32xbf16>
      %cst_65 = arith.constant dense<0.000000e+00> : vector<32x32xf32>
      %94 = tpu.matmul %92, %93, %cst_65 {dimension_numbers = #tpu.dot_dimension_numbers<[1], [0], [0], [1], [0, 0, 1, 1], [], []>} : vector<32x16xbf16>, vector<16x32xbf16>, vector<32x32xf32> -> vector<32x32xf32>
      %c0_66 = arith.constant 0 : index
      %c0_67 = arith.constant 0 : index
      %95 = vector.load %arg7[%c0_66, %c0_67] : memref<1x32xf32, #tpu.memory_space<vmem>>, vector<1x32xf32>
      %96 = vector.broadcast %95 : vector<1x32xf32> to vector<32x32xf32>
      %97 = arith.addf %94, %96 : vector<32x32xf32>
      %c0_68 = arith.constant 0 : index
      %c0_69 = arith.constant 0 : index
      %98 = vector.load %arg31[%c0_68, %c0_69] : memref<32x32xf32, #tpu.memory_space<vmem>>, vector<32x32xf32>
      tpu.vector_store %arg31[%c0_68, %c0_69], %97 {strides = array<i32>} : memref<32x32xf32, #tpu.memory_space<vmem>>, vector<32x32xf32>,
      %c0_70 = arith.constant 0 : index
      %c0_71 = arith.constant 0 : index
      %99 = vector.load %arg2[%c0_70, %c0_71] : memref<48x8xbf16, #tpu.memory_space<vmem>>, vector<48x8xbf16>
      %c0_72 = arith.constant 0 : index
      %c0_73 = arith.constant 0 : index
      %100 = vector.load %arg8[%c0_72, %c0_73] : memref<8x16xbf16, #tpu.memory_space<vmem>>, vector<8x16xbf16>
      %cst_74 = arith.constant dense<0.000000e+00> : vector<48x16xf32>
      %101 = tpu.matmul %99, %100, %cst_74 {dimension_numbers = #tpu.dot_dimension_numbers<[1], [0], [0], [1], [0, 0, 1, 1], [], []>} : vector<48x8xbf16>, vector<8x16xbf16>, vector<48x16xf32> -> vector<48x16xf32>
      %c0_75 = arith.constant 0 : index
      %c0_76 = arith.constant 0 : index
      %102 = vector.load %arg9[%c0_75, %c0_76] : memref<1x16xf32, #tpu.memory_space<vmem>>, vector<1x16xf32>
      %103 = vector.broadcast %102 : vector<1x16xf32> to vector<48x16xf32>
      %104 = arith.addf %101, %103 : vector<48x16xf32>
      %c0_77 = arith.constant 0 : index
      %c0_78 = arith.constant 0 : index
      %105 = vector.load %arg32[%c0_77, %c0_78] : memref<48x16xf32, #tpu.memory_space<vmem>>, vector<48x16xf32>
      tpu.vector_store %arg32[%c0_77, %c0_78], %104 {strides = array<i32>} : memref<48x16xf32, #tpu.memory_space<vmem>>, vector<48x16xf32>,
    } else {
    }
    %c0 = arith.constant 0 : index
    %c0_1 = arith.constant 0 : index
    %3 = vector.load %arg31[%c0, %c0_1] : memref<32x32xf32, #tpu.memory_space<vmem>>, vector<32x32xf32>
    %4 = arith.truncf %3 : vector<32x32xf32> to vector<32x32xbf16>
    %c0_2 = arith.constant 0 : index
    %c0_3 = arith.constant 0 : index
    %5 = vector.load %arg3[%c0_2, %c0_3] : memref<96x32xbf16, #tpu.memory_space<vmem>>, vector<96x32xbf16>
    %cst = arith.constant dense<0.000000e+00> : vector<96x32xf32>
    %6 = tpu.matmul %5, %4, %cst {dimension_numbers = #tpu.dot_dimension_numbers<[1], [0], [0], [1], [0, 0, 1, 1], [], []>} : vector<96x32xbf16>, vector<32x32xbf16>, vector<96x32xf32> -> vector<96x32xf32>
    %7 = vector.extract_strided_slice %6 {offsets = [0, 0], sizes = [48, 32], strides = [1, 1]} : vector<96x32xf32> to vector<48x32xf32>
    %8 = vector.extract_strided_slice %6 {offsets = [48, 0], sizes = [48, 32], strides = [1, 1]} : vector<96x32xf32> to vector<48x32xf32>
    %c0_4 = arith.constant 0 : index
    %c0_5 = arith.constant 0 : index
    %9 = vector.load %arg32[%c0_4, %c0_5] : memref<48x16xf32, #tpu.memory_space<vmem>>, vector<48x16xf32>
    %10 = tpu.concatenate %7, %8, %9 in 1 : vector<48x32xf32>, vector<48x32xf32>, vector<48x16xf32> -> vector<48x80xf32>
    %11 = arith.truncf %10 : vector<48x80xf32> to vector<48x80xbf16>
    %c0_6 = arith.constant 0 : index
    %c0_7 = arith.constant 0 : index
    %c0_8 = arith.constant 0 : index
    %12 = vector.load %arg18[%c0_6, %c0_7, %c0_8] : memref<1x80x128xbf16, #tpu.memory_space<vmem>>, vector<1x80x128xbf16>
    %13 = vector.shape_cast %12 : vector<1x80x128xbf16> to vector<80x128xbf16>
    %cst_9 = arith.constant dense<0.000000e+00> : vector<48x128xf32>
    %14 = tpu.matmul %11, %13, %cst_9 {dimension_numbers = #tpu.dot_dimension_numbers<[1], [0], [0], [1], [0, 0, 1, 1], [], []>} : vector<48x80xbf16>, vector<80x128xbf16>, vector<48x128xf32> -> vector<48x128xf32>
    %c0_10 = arith.constant 0 : index
    %c0_11 = arith.constant 0 : index
    %c0_12 = arith.constant 0 : index
    %15 = vector.load %arg19[%c0_10, %c0_11, %c0_12] : memref<1x1x128xf32, #tpu.memory_space<vmem>>, vector<1x1x128xf32>
    %16 = vector.shape_cast %15 : vector<1x1x128xf32> to vector<1x128xf32>
    %17 = vector.broadcast %16 : vector<1x128xf32> to vector<48x128xf32>
    %18 = arith.addf %14, %17 : vector<48x128xf32>
    %cst_13 = arith.constant 0.000000e+00 : f32
    %19 = vector.broadcast %cst_13 : f32 to vector<48x128xf32>
    %20 = arith.maximumf %18, %19 : vector<48x128xf32>
    %21 = vector.extract_strided_slice %20 {offsets = [0, 0], sizes = [48, 64], strides = [1, 1]} : vector<48x128xf32> to vector<48x64xf32>
    %22 = arith.truncf %21 : vector<48x64xf32> to vector<48x64xbf16>
    %c0_14 = arith.constant 0 : index
    %c0_15 = arith.constant 0 : index
    %c0_16 = arith.constant 0 : index
    %23 = vector.load %arg20[%c0_14, %c0_15, %c0_16] : memref<1x64x64xbf16, #tpu.memory_space<vmem>>, vector<1x64x64xbf16>
    %24 = vector.shape_cast %23 : vector<1x64x64xbf16> to vector<64x64xbf16>
    %cst_17 = arith.constant dense<0.000000e+00> : vector<48x64xf32>
    %25 = tpu.matmul %22, %24, %cst_17 {dimension_numbers = #tpu.dot_dimension_numbers<[1], [0], [0], [1], [0, 0, 1, 1], [], []>} : vector<48x64xbf16>, vector<64x64xbf16>, vector<48x64xf32> -> vector<48x64xf32>
    %c0_18 = arith.constant 0 : index
    %c0_19 = arith.constant 0 : index
    %c0_20 = arith.constant 0 : index
    %26 = vector.load %arg21[%c0_18, %c0_19, %c0_20] : memref<1x1x64xf32, #tpu.memory_space<vmem>>, vector<1x1x64xf32>
    %27 = vector.shape_cast %26 : vector<1x1x64xf32> to vector<1x64xf32>
    %28 = vector.broadcast %27 : vector<1x64xf32> to vector<48x64xf32>
    %29 = arith.addf %25, %28 : vector<48x64xf32>
    %30 = vector.extract_strided_slice %20 {offsets = [0, 64], sizes = [48, 64], strides = [1, 1]} : vector<48x128xf32> to vector<48x64xf32>
    %31 = arith.truncf %30 : vector<48x64xf32> to vector<48x64xbf16>
    %c0_21 = arith.constant 0 : index
    %c0_22 = arith.constant 0 : index
    %c0_23 = arith.constant 0 : index
    %32 = vector.load %arg22[%c0_21, %c0_22, %c0_23] : memref<1x64x64xbf16, #tpu.memory_space<vmem>>, vector<1x64x64xbf16>
    %33 = vector.shape_cast %32 : vector<1x64x64xbf16> to vector<64x64xbf16>
    %cst_24 = arith.constant dense<0.000000e+00> : vector<48x64xf32>
    %34 = tpu.matmul %31, %33, %cst_24 {dimension_numbers = #tpu.dot_dimension_numbers<[1], [0], [0], [1], [0, 0, 1, 1], [], []>} : vector<48x64xbf16>, vector<64x64xbf16>, vector<48x64xf32> -> vector<48x64xf32>
    %c0_25 = arith.constant 0 : index
    %c0_26 = arith.constant 0 : index
    %c0_27 = arith.constant 0 : index
    %35 = vector.load %arg23[%c0_25, %c0_26, %c0_27] : memref<1x1x64xf32, #tpu.memory_space<vmem>>, vector<1x1x64xf32>
    %36 = vector.shape_cast %35 : vector<1x1x64xf32> to vector<1x64xf32>
    %37 = vector.broadcast %36 : vector<1x64xf32> to vector<48x64xf32>
    %38 = arith.addf %34, %37 : vector<48x64xf32>
    %39 = tpu.concatenate %38, %29 in 0 : vector<48x64xf32>, vector<48x64xf32> -> vector<96x64xf32>
    %40 = arith.truncf %39 : vector<96x64xf32> to vector<96x64xbf16>
    %cst_28 = arith.constant dense<0.000000e+00> : vector<32x64xf32>
    %41 = tpu.matmul %5, %40, %cst_28 {dimension_numbers = #tpu.dot_dimension_numbers<[0], [0], [1], [1], [0, 1, 1, 1], [], []>} : vector<96x32xbf16>, vector<96x64xbf16>, vector<32x64xf32> -> vector<32x64xf32>
    %cst_29 = arith.constant dense<0.000000e+00> : vector<32x32xf32>
    %42 = tpu.matmul %4, %4, %cst_29 {dimension_numbers = #tpu.dot_dimension_numbers<[1], [1], [0], [0], [0, 0, 1, 0], [], []>} : vector<32x32xbf16>, vector<32x32xbf16>, vector<32x32xf32> -> vector<32x32xf32>
    %c0_30 = arith.constant 0 : index
    %c0_31 = arith.constant 0 : index
    %43 = vector.load %arg4[%c0_30, %c0_31] : memref<32x32xf32, #tpu.memory_space<vmem>>, vector<32x32xf32>
    %44 = arith.addf %42, %43 : vector<32x32xf32>
    %cst_32 = arith.constant dense<0xFF800000> : vector<32xf32>
    %45 = vector.multi_reduction <maximumf>, %44, %cst_32 [1] : vector<32x32xf32> to vector<32xf32>
    %46 = vector.shape_cast %45 : vector<32xf32> to vector<32x1xf32>
    %47 = vector.broadcast %46 : vector<32x1xf32> to vector<32x32xf32>
    %48 = arith.subf %44, %47 : vector<32x32xf32>
    %49 = math.exp %48 : vector<32x32xf32>
    %cst_33 = arith.constant dense<0.000000e+00> : vector<32xf32>
    %50 = vector.multi_reduction <add>, %49, %cst_33 [1] : vector<32x32xf32> to vector<32xf32>
    %51 = vector.shape_cast %50 : vector<32xf32> to vector<32x1xf32>
    %52 = arith.truncf %49 : vector<32x32xf32> to vector<32x32xbf16>
    %cst_34 = arith.constant dense<0.000000e+00> : vector<32x32xf32>
    %53 = tpu.matmul %52, %4, %cst_34 {dimension_numbers = #tpu.dot_dimension_numbers<[1], [0], [0], [1], [0, 0, 1, 1], [], []>} : vector<32x32xbf16>, vector<32x32xbf16>, vector<32x32xf32> -> vector<32x32xf32>
    %54 = tpu.reciprocal %51 {approx = true} : vector<32x1xf32> -> vector<32x1xf32>
    %55 = vector.broadcast %54 : vector<32x1xf32> to vector<32x32xf32>
    %56 = arith.mulf %53, %55 : vector<32x32xf32>
    %57 = arith.subf %3, %56 : vector<32x32xf32>
    %58 = tpu.concatenate %41, %57, %3 in 1 : vector<32x64xf32>, vector<32x32xf32>, vector<32x32xf32> -> vector<32x128xf32>
    %59 = arith.truncf %58 : vector<32x128xf32> to vector<32x128xbf16>
    %c0_35 = arith.constant 0 : index
    %c0_36 = arith.constant 0 : index
    %c0_37 = arith.constant 0 : index
    %60 = vector.load %arg24[%c0_35, %c0_36, %c0_37] : memref<1x128x64xbf16, #tpu.memory_space<vmem>>, vector<1x128x64xbf16>
    %61 = vector.shape_cast %60 : vector<1x128x64xbf16> to vector<128x64xbf16>
    %cst_38 = arith.constant dense<0.000000e+00> : vector<32x64xf32>
    %62 = tpu.matmul %59, %61, %cst_38 {dimension_numbers = #tpu.dot_dimension_numbers<[1], [0], [0], [1], [0, 0, 1, 1], [], []>} : vector<32x128xbf16>, vector<128x64xbf16>, vector<32x64xf32> -> vector<32x64xf32>
    %c0_39 = arith.constant 0 : index
    %c0_40 = arith.constant 0 : index
    %c0_41 = arith.constant 0 : index
    %63 = vector.load %arg25[%c0_39, %c0_40, %c0_41] : memref<1x1x64xf32, #tpu.memory_space<vmem>>, vector<1x1x64xf32>
    %64 = vector.shape_cast %63 : vector<1x1x64xf32> to vector<1x64xf32>
    %65 = vector.broadcast %64 : vector<1x64xf32> to vector<32x64xf32>
    %66 = arith.addf %62, %65 : vector<32x64xf32>
    %cst_42 = arith.constant 0.000000e+00 : f32
    %67 = vector.broadcast %cst_42 : f32 to vector<32x64xf32>
    %68 = arith.maximumf %66, %67 : vector<32x64xf32>
    %69 = arith.truncf %68 : vector<32x64xf32> to vector<32x64xbf16>
    %c0_43 = arith.constant 0 : index
    %c0_44 = arith.constant 0 : index
    %c0_45 = arith.constant 0 : index
    %70 = vector.load %arg26[%c0_43, %c0_44, %c0_45] : memref<1x64x64xbf16, #tpu.memory_space<vmem>>, vector<1x64x64xbf16>
    %71 = vector.shape_cast %70 : vector<1x64x64xbf16> to vector<64x64xbf16>
    %cst_46 = arith.constant dense<0.000000e+00> : vector<32x64xf32>
    %72 = tpu.matmul %69, %71, %cst_46 {dimension_numbers = #tpu.dot_dimension_numbers<[1], [0], [0], [1], [0, 0, 1, 1], [], []>} : vector<32x64xbf16>, vector<64x64xbf16>, vector<32x64xf32> -> vector<32x64xf32>
    %c0_47 = arith.constant 0 : index
    %c0_48 = arith.constant 0 : index
    %c0_49 = arith.constant 0 : index
    %73 = vector.load %arg27[%c0_47, %c0_48, %c0_49] : memref<1x1x64xf32, #tpu.memory_space<vmem>>, vector<1x1x64xf32>
    %74 = vector.shape_cast %73 : vector<1x1x64xf32> to vector<1x64xf32>
    %75 = vector.broadcast %74 : vector<1x64xf32> to vector<32x64xf32>
    %76 = arith.addf %72, %75 : vector<32x64xf32>
    %cst_50 = arith.constant 0.000000e+00 : f32
    %77 = vector.broadcast %cst_50 : f32 to vector<32x64xf32>
    %78 = arith.maximumf %76, %77 : vector<32x64xf32>
    %79 = arith.truncf %78 : vector<32x64xf32> to vector<32x64xbf16>
    %c0_51 = arith.constant 0 : index
    %c0_52 = arith.constant 0 : index
    %c0_53 = arith.constant 0 : index
    %80 = vector.load %arg28[%c0_51, %c0_52, %c0_53] : memref<1x64x32xbf16, #tpu.memory_space<vmem>>, vector<1x64x32xbf16>
    %81 = vector.shape_cast %80 : vector<1x64x32xbf16> to vector<64x32xbf16>
    %cst_54 = arith.constant dense<0.000000e+00> : vector<32x32xf32>
    %82 = tpu.matmul %79, %81, %cst_54 {dimension_numbers = #tpu.dot_dimension_numbers<[1], [0], [0], [1], [0, 0, 1, 1], [], []>} : vector<32x64xbf16>, vector<64x32xbf16>, vector<32x32xf32> -> vector<32x32xf32>
    %c0_55 = arith.constant 0 : index
    %c0_56 = arith.constant 0 : index
    %c0_57 = arith.constant 0 : index
    %83 = vector.load %arg29[%c0_55, %c0_56, %c0_57] : memref<1x1x32xf32, #tpu.memory_space<vmem>>, vector<1x1x32xf32>
    %84 = vector.shape_cast %83 : vector<1x1x32xf32> to vector<1x32xf32>
    %85 = vector.broadcast %84 : vector<1x32xf32> to vector<32x32xf32>
    %86 = arith.addf %82, %85 : vector<32x32xf32>
    %87 = arith.addf %3, %86 : vector<32x32xf32>
    %c0_58 = arith.constant 0 : index
    %c0_59 = arith.constant 0 : index
    %88 = vector.load %arg31[%c0_58, %c0_59] : memref<32x32xf32, #tpu.memory_space<vmem>>, vector<32x32xf32>
    tpu.vector_store %arg31[%c0_58, %c0_59], %87 {strides = array<i32>} : memref<32x32xf32, #tpu.memory_space<vmem>>, vector<32x32xf32>,
    %c1_i32 = arith.constant 1 : i32
    %89 = arith.cmpi eq, %arg0, %c1_i32 : i32
    %90 = arith.extui %89 : i1 to i32
    %c0_i32_60 = arith.constant 0 : i32
    %91 = arith.cmpi ne, %90, %c0_i32_60 : i32
    scf.if %91 {
      %92 = arith.truncf %87 : vector<32x32xf32> to vector<32x32xbf16>
      %c0_61 = arith.constant 0 : index
      %c0_62 = arith.constant 0 : index
      %93 = vector.load %arg10[%c0_61, %c0_62] : memref<32x64xbf16, #tpu.memory_space<vmem>>, vector<32x64xbf16>
      %cst_63 = arith.constant dense<0.000000e+00> : vector<32x64xf32>
      %94 = tpu.matmul %92, %93, %cst_63 {dimension_numbers = #tpu.dot_dimension_numbers<[1], [0], [0], [1], [0, 0, 1, 1], [], []>} : vector<32x32xbf16>, vector<32x64xbf16>, vector<32x64xf32> -> vector<32x64xf32>
      %c0_64 = arith.constant 0 : index
      %c0_65 = arith.constant 0 : index
      %95 = vector.load %arg11[%c0_64, %c0_65] : memref<1x64xf32, #tpu.memory_space<vmem>>, vector<1x64xf32>
      %96 = vector.broadcast %95 : vector<1x64xf32> to vector<32x64xf32>
      %97 = arith.addf %94, %96 : vector<32x64xf32>
      %98 = arith.negf %97 : vector<32x64xf32>
      %99 = math.exp %98 : vector<32x64xf32>
      %cst_66 = arith.constant 1.000000e+00 : f32
      %100 = vector.broadcast %cst_66 : f32 to vector<32x64xf32>
      %101 = arith.addf %100, %99 : vector<32x64xf32>
      %102 = arith.divf %100, %101 : vector<32x64xf32>
      %c0_67 = arith.constant 0 : index
      %c0_68 = arith.constant 0 : index
      %103 = vector.load %arg12[%c0_67, %c0_68] : memref<32x64xbf16, #tpu.memory_space<vmem>>, vector<32x64xbf16>
      %cst_69 = arith.constant dense<0.000000e+00> : vector<32x64xf32>
      %104 = tpu.matmul %92, %103, %cst_69 {dimension_numbers = #tpu.dot_dimension_numbers<[1], [0], [0], [1], [0, 0, 1, 1], [], []>} : vector<32x32xbf16>, vector<32x64xbf16>, vector<32x64xf32> -> vector<32x64xf32>
      %c0_70 = arith.constant 0 : index
      %c0_71 = arith.constant 0 : index
      %105 = vector.load %arg13[%c0_70, %c0_71] : memref<1x64xf32, #tpu.memory_space<vmem>>, vector<1x64xf32>
      %106 = vector.broadcast %105 : vector<1x64xf32> to vector<32x64xf32>
      %107 = arith.addf %104, %106 : vector<32x64xf32>
      %108 = arith.mulf %107, %102 : vector<32x64xf32>
      %c0_72 = arith.constant 0 : index
      %c0_73 = arith.constant 0 : index
      %109 = vector.load %arg5[%c0_72, %c0_73] : memref<4x32xbf16, #tpu.memory_space<vmem>>, vector<4x32xbf16>
      %110 = arith.truncf %108 : vector<32x64xf32> to vector<32x64xbf16>
      %cst_74 = arith.constant dense<0.000000e+00> : vector<4x64xf32>
      %111 = tpu.matmul %109, %110, %cst_74 {dimension_numbers = #tpu.dot_dimension_numbers<[1], [0], [0], [1], [0, 0, 1, 1], [], []>} : vector<4x32xbf16>, vector<32x64xbf16>, vector<4x64xf32> -> vector<4x64xf32>
      %112 = arith.truncf %111 : vector<4x64xf32> to vector<4x64xbf16>
      %c0_75 = arith.constant 0 : index
      %c0_76 = arith.constant 0 : index
      %113 = vector.load %arg14[%c0_75, %c0_76] : memref<64x64xbf16, #tpu.memory_space<vmem>>, vector<64x64xbf16>
      %cst_77 = arith.constant dense<0.000000e+00> : vector<4x64xf32>
      %114 = tpu.matmul %112, %113, %cst_77 {dimension_numbers = #tpu.dot_dimension_numbers<[1], [0], [0], [1], [0, 0, 1, 1], [], []>} : vector<4x64xbf16>, vector<64x64xbf16>, vector<4x64xf32> -> vector<4x64xf32>
      %c0_78 = arith.constant 0 : index
      %c0_79 = arith.constant 0 : index
      %115 = vector.load %arg15[%c0_78, %c0_79] : memref<1x64xf32, #tpu.memory_space<vmem>>, vector<1x64xf32>
      %116 = vector.broadcast %115 : vector<1x64xf32> to vector<4x64xf32>
      %117 = arith.addf %114, %116 : vector<4x64xf32>
      %cst_80 = arith.constant 0.000000e+00 : f32
      %118 = vector.broadcast %cst_80 : f32 to vector<4x64xf32>
      %119 = arith.maximumf %117, %118 : vector<4x64xf32>
      %120 = arith.truncf %119 : vector<4x64xf32> to vector<4x64xbf16>
      %c0_81 = arith.constant 0 : index
      %c0_82 = arith.constant 0 : index
      %121 = vector.load %arg16[%c0_81, %c0_82] : memref<64x64xbf16, #tpu.memory_space<vmem>>, vector<64x64xbf16>
      %cst_83 = arith.constant dense<0.000000e+00> : vector<4x64xf32>
      %122 = tpu.matmul %120, %121, %cst_83 {dimension_numbers = #tpu.dot_dimension_numbers<[1], [0], [0], [1], [0, 0, 1, 1], [], []>} : vector<4x64xbf16>, vector<64x64xbf16>, vector<4x64xf32> -> vector<4x64xf32>
      %c0_84 = arith.constant 0 : index
      %c0_85 = arith.constant 0 : index
      %123 = vector.load %arg17[%c0_84, %c0_85] : memref<1x64xf32, #tpu.memory_space<vmem>>, vector<1x64xf32>
      %124 = vector.broadcast %123 : vector<1x64xf32> to vector<4x64xf32>
      %125 = arith.addf %122, %124 : vector<4x64xf32>
      %c0_86 = arith.constant 0 : index
      %c0_87 = arith.constant 0 : index
      %126 = vector.load %arg30[%c0_86, %c0_87] : memref<4x64xf32, #tpu.memory_space<vmem>>, vector<4x64xf32>
      tpu.vector_store %arg30[%c0_86, %c0_87], %125 {strides = array<i32>} : memref<4x64xf32, #tpu.memory_space<vmem>>, vector<4x64xf32>,
    } else {
    }
    return
  }
  func.func @transform_0(%arg0: i32) -> (i32, i32) {
    %c0_i32 = arith.constant 0 : i32
    %c0_i32_0 = arith.constant 0 : i32
    %c0_i32_1 = arith.constant 0 : i32
    return %c0_i32, %c0_i32_0 : i32, i32
  }
  func.func @transform_1(%arg0: i32) -> (i32, i32) {
    %c0_i32 = arith.constant 0 : i32
    %c0_i32_0 = arith.constant 0 : i32
    %c0_i32_1 = arith.constant 0 : i32
    return %c0_i32, %c0_i32_0 : i32, i32
  }
  func.func @transform_2(%arg0: i32) -> (i32, i32) {
    %c0_i32 = arith.constant 0 : i32
    %c0_i32_0 = arith.constant 0 : i32
    %c0_i32_1 = arith.constant 0 : i32
    return %c0_i32, %c0_i32_0 : i32, i32
  }
  func.func @transform_3(%arg0: i32) -> (i32, i32) {
    %c0_i32 = arith.constant 0 : i32
    %c0_i32_0 = arith.constant 0 : i32
    %c0_i32_1 = arith.constant 0 : i32
    return %c0_i32, %c0_i32_0 : i32, i32
  }
  func.func @transform_4(%arg0: i32) -> (i32, i32) {
    %c0_i32 = arith.constant 0 : i32
    %c0_i32_0 = arith.constant 0 : i32
    %c0_i32_1 = arith.constant 0 : i32
    return %c0_i32, %c0_i32_0 : i32, i32
  }
  func.func @transform_5(%arg0: i32) -> (i32, i32) {
    %c0_i32 = arith.constant 0 : i32
    %c0_i32_0 = arith.constant 0 : i32
    %c0_i32_1 = arith.constant 0 : i32
    return %c0_i32, %c0_i32_0 : i32, i32
  }
  func.func @transform_6(%arg0: i32) -> (i32, i32) {
    %c0_i32 = arith.constant 0 : i32
    %c0_i32_0 = arith.constant 0 : i32
    %c0_i32_1 = arith.constant 0 : i32
    return %c0_i32, %c0_i32_0 : i32, i32
  }
  func.func @transform_7(%arg0: i32) -> (i32, i32) {
    %c0_i32 = arith.constant 0 : i32
    %c0_i32_0 = arith.constant 0 : i32
    %c0_i32_1 = arith.constant 0 : i32
    return %c0_i32, %c0_i32_0 : i32, i32
  }
  func.func @transform_8(%arg0: i32) -> (i32, i32) {
    %c0_i32 = arith.constant 0 : i32
    %c0_i32_0 = arith.constant 0 : i32
    %c0_i32_1 = arith.constant 0 : i32
    return %c0_i32, %c0_i32_0 : i32, i32
  }
  func.func @transform_9(%arg0: i32) -> (i32, i32) {
    %c0_i32 = arith.constant 0 : i32
    %c0_i32_0 = arith.constant 0 : i32
    %c0_i32_1 = arith.constant 0 : i32
    return %c0_i32, %c0_i32_0 : i32, i32
  }
  func.func @transform_10(%arg0: i32) -> (i32, i32) {
    %c0_i32 = arith.constant 0 : i32
    %c0_i32_0 = arith.constant 0 : i32
    %c0_i32_1 = arith.constant 0 : i32
    return %c0_i32, %c0_i32_0 : i32, i32
  }
  func.func @transform_11(%arg0: i32) -> (i32, i32) {
    %c0_i32 = arith.constant 0 : i32
    %c0_i32_0 = arith.constant 0 : i32
    %c0_i32_1 = arith.constant 0 : i32
    return %c0_i32, %c0_i32_0 : i32, i32
  }
  func.func @transform_12(%arg0: i32) -> (i32, i32) {
    %c0_i32 = arith.constant 0 : i32
    %c0_i32_0 = arith.constant 0 : i32
    %c0_i32_1 = arith.constant 0 : i32
    return %c0_i32, %c0_i32_0 : i32, i32
  }
  func.func @transform_13(%arg0: i32) -> (i32, i32) {
    %c0_i32 = arith.constant 0 : i32
    %c0_i32_0 = arith.constant 0 : i32
    %c0_i32_1 = arith.constant 0 : i32
    return %c0_i32, %c0_i32_0 : i32, i32
  }
  func.func @transform_14(%arg0: i32) -> (i32, i32) {
    %c0_i32 = arith.constant 0 : i32
    %c0_i32_0 = arith.constant 0 : i32
    %c0_i32_1 = arith.constant 0 : i32
    return %c0_i32, %c0_i32_0 : i32, i32
  }
  func.func @transform_15(%arg0: i32) -> (i32, i32) {
    %c0_i32 = arith.constant 0 : i32
    %c0_i32_0 = arith.constant 0 : i32
    %c0_i32_1 = arith.constant 0 : i32
    return %c0_i32, %c0_i32_0 : i32, i32
  }
  func.func @transform_16(%arg0: i32) -> (i32, i32) {
    %c0_i32 = arith.constant 0 : i32
    %c0_i32_0 = arith.constant 0 : i32
    %c0_i32_1 = arith.constant 0 : i32
    return %c0_i32, %c0_i32_0 : i32, i32
  }
  func.func @transform_17(%arg0: i32) -> (i32, i32, i32) {
    %c0_i32 = arith.constant 0 : i32
    %c0_i32_0 = arith.constant 0 : i32
    %c0_i32_1 = arith.constant 0 : i32
    return %arg0, %c0_i32, %c0_i32_0 : i32, i32, i32
  }
  func.func @transform_18(%arg0: i32) -> (i32, i32, i32) {
    %c0_i32 = arith.constant 0 : i32
    %c0_i32_0 = arith.constant 0 : i32
    %c0_i32_1 = arith.constant 0 : i32
    return %arg0, %c0_i32, %c0_i32_0 : i32, i32, i32
  }
  func.func @transform_19(%arg0: i32) -> (i32, i32, i32) {
    %c0_i32 = arith.constant 0 : i32
    %c0_i32_0 = arith.constant 0 : i32
    %c0_i32_1 = arith.constant 0 : i32
    return %arg0, %c0_i32, %c0_i32_0 : i32, i32, i32
  }
  func.func @transform_20(%arg0: i32) -> (i32, i32, i32) {
    %c0_i32 = arith.constant 0 : i32
    %c0_i32_0 = arith.constant 0 : i32
    %c0_i32_1 = arith.constant 0 : i32
    return %arg0, %c0_i32, %c0_i32_0 : i32, i32, i32
  }
  func.func @transform_21(%arg0: i32) -> (i32, i32, i32) {
    %c0_i32 = arith.constant 0 : i32
    %c0_i32_0 = arith.constant 0 : i32
    %c0_i32_1 = arith.constant 0 : i32
    return %arg0, %c0_i32, %c0_i32_0 : i32, i32, i32
  }
  func.func @transform_22(%arg0: i32) -> (i32, i32, i32) {
    %c0_i32 = arith.constant 0 : i32
    %c0_i32_0 = arith.constant 0 : i32
    %c0_i32_1 = arith.constant 0 : i32
    return %arg0, %c0_i32, %c0_i32_0 : i32, i32, i32
  }
  func.func @transform_23(%arg0: i32) -> (i32, i32, i32) {
    %c0_i32 = arith.constant 0 : i32
    %c0_i32_0 = arith.constant 0 : i32
    %c0_i32_1 = arith.constant 0 : i32
    return %arg0, %c0_i32, %c0_i32_0 : i32, i32, i32
  }
  func.func @transform_24(%arg0: i32) -> (i32, i32, i32) {
    %c0_i32 = arith.constant 0 : i32
    %c0_i32_0 = arith.constant 0 : i32
    %c0_i32_1 = arith.constant 0 : i32
    return %arg0, %c0_i32, %c0_i32_0 : i32, i32, i32
  }
  func.func @transform_25(%arg0: i32) -> (i32, i32, i32) {
    %c0_i32 = arith.constant 0 : i32
    %c0_i32_0 = arith.constant 0 : i32
    %c0_i32_1 = arith.constant 0 : i32
    return %arg0, %c0_i32, %c0_i32_0 : i32, i32, i32
  }
  func.func @transform_26(%arg0: i32) -> (i32, i32, i32) {
    %c0_i32 = arith.constant 0 : i32
    %c0_i32_0 = arith.constant 0 : i32
    %c0_i32_1 = arith.constant 0 : i32
    return %arg0, %c0_i32, %c0_i32_0 : i32, i32, i32
  }
  func.func @transform_27(%arg0: i32) -> (i32, i32, i32) {
    %c0_i32 = arith.constant 0 : i32
    %c0_i32_0 = arith.constant 0 : i32
    %c0_i32_1 = arith.constant 0 : i32
    return %arg0, %c0_i32, %c0_i32_0 : i32, i32, i32
  }
  func.func @transform_28(%arg0: i32) -> (i32, i32, i32) {
    %c0_i32 = arith.constant 0 : i32
    %c0_i32_0 = arith.constant 0 : i32
    %c0_i32_1 = arith.constant 0 : i32
    return %arg0, %c0_i32, %c0_i32_0 : i32, i32, i32
  }
  func.func @transform_29(%arg0: i32) -> (i32, i32) {
    %c0_i32 = arith.constant 0 : i32
    %c0_i32_0 = arith.constant 0 : i32
    %c0_i32_1 = arith.constant 0 : i32
    return %c0_i32, %c0_i32_0 : i32, i32
  }
}

</mosaic_0001>

<bundles_post_ra>
// kernel: tree_matching_net_forward.1
= control target key start
LH: loop header
LB: loop body
LE: loop exit
PB: predicated region body
PF: predicated region fallthrough
CT: control target
= control target key end

     0   :  { %s3052_s6 = smov 1   ;;  %s3053_s10 = smov 2   ;;  %s3608_s0 = inlined_call_operand.smem [shape: u32[30], index: -1, kind: input, shape index: {}] }
   0x1   :  { %s3093_s5 = sld [smem:[%s3608_s0]]   ;;  %s3054_s14 = smov 3  }
   0x2   :  { %s3098_s9 = sld [smem:[%s3608_s0 + %s3052_s6]]   ;;  %s3055_s18 = smov 4  }
   0x3   :  { %s3103_s13 = sld [smem:[%s3608_s0 + %s3053_s10]]   ;;  %s3056_s22 = smov 5  }
   0x4   :  { %s3108_s17 = sld [smem:[%s3608_s0 + %s3054_s14]]   ;;  %s3057_s26 = smov 6  }
   0x5   :  { %s3113_s21 = sld [smem:[%s3608_s0 + %s3055_s18]]   ;;  %s3058_s30 = smov 7  }
   0x6   :  { %s3118_s25 = sld [smem:[%s3608_s0 + %s3056_s22]]   ;;  %s3059_s4 = smov 8  }
   0x7   :  { %3619 = sst [smem:[#allocation7_spill]] %s3093_s5  ;;  %s3060_s10 = smov 9  }
   0x8   :  { %3620 = sst [smem:[#allocation8_spill]] %s3098_s9  ;;  %s3061_s15 = smov 10  }
   0x9   :  { %3621 = sst [smem:[#allocation9_spill]] %s3103_s13  ;;  %s3062_s20 = smov 11  }
   0xa   :  { %3622 = sst [smem:[#allocation10_spill]] %s3108_s17  ;;  %s3064_s1 = smov 13  }
   0xb   :  { %3623 = sst [smem:[#allocation11_spill]] %s3113_s21  ;;  %s3065_s7 = smov 14  }
   0xc   :  { %s3123_s29 = sld [smem:[%s3608_s0 + %s3057_s26]]   ;;  %s3063_s26 = smov 12  }
   0xd   :  { %s3128_s3 = sld [smem:[%s3608_s0 + %s3058_s30]]   ;;  %s3067_s22 = smov 16  }
   0xe   :  { %s3133_s8 = sld [smem:[%s3608_s0 + %s3059_s4]]   ;;  %s3068_s28 = smov 17  }
   0xf   :  { %s3138_s14 = sld [smem:[%s3608_s0 + %s3060_s10]]  }
  0x10   :  { %s3143_s19 = sld [smem:[%s3608_s0 + %s3061_s15]]   ;;  %s3066_s15 = smov 15  }
  0x11   :  { %s3148_s24 = sld [smem:[%s3608_s0 + %s3062_s20]]  }
  0x12   :  { %3624 = sst [smem:[#allocation12_spill]] %s3123_s29 }
  0x13   :  { %s3153_s30 = sld [smem:[%s3608_s0 + %s3063_s26]]  }
  0x14   :  { %3625 = sst [smem:[#allocation13_spill]] %s3133_s8 }
  0x15   :  { %3626 = sst [smem:[#allocation14_spill]] %s3138_s14 }
  0x16   :  { %3627 = sst [smem:[#allocation15_spill]] %s3143_s19 }
  0x17   :  { %3628 = sst [smem:[#allocation16_spill]] %s3148_s24 }
  0x18   :  { %s3158_s6 = sld [smem:[%s3608_s0 + %s3064_s1]]  }
  0x19   :  { %3629 = sst [smem:[#allocation17_spill]] %s3153_s30 }
  0x1a   :  { %s3163_s12 = sld [smem:[%s3608_s0 + %s3065_s7]]   ;;  %s3069_s7 = smov 18  }
  0x1b   :  { %s3168_s20 = sld [smem:[%s3608_s0 + %s3066_s15]]   ;;  %s3070_s15 = smov 19  }
  0x1c   :  { %s3173_s27 = sld [smem:[%s3608_s0 + %s3067_s22]]   ;;  %s3071_s22 = smov 20  }
  0x1d   :  { %s3178_s4 = sld [smem:[%s3608_s0 + %s3068_s28]]   ;;  %s3072_s28 = smov 21  }
  0x1e   :  { %3630 = sst [smem:[#allocation18_spill]] %s3158_s6 }
  0x1f   :  { %s3198_s21 = sld [smem:[%s3608_s0 + %s3072_s28]]   ;;  %s3076_s28 = smov 25  }
  0x20   :  { %3631 = sst [smem:[#allocation19_spill]] %s3163_s12 }
  0x21   :  { %3632 = sst [smem:[#allocation20_spill]] %s3168_s20 }
  0x22   :  { %3633 = sst [smem:[#allocation21_spill]] %s3173_s27 }
  0x23   :  { %s3183_s12 = sld [smem:[%s3608_s0 + %s3069_s7]]   ;;  %s3073_s7 = smov 22  }
  0x24   :  { %s3188_s20 = sld [smem:[%s3608_s0 + %s3070_s15]]   ;;  %s3074_s15 = smov 23  }
  0x25   :  { %s3193_s27 = sld [smem:[%s3608_s0 + %s3071_s22]]   ;;  %s3075_s22 = smov 24  }
  0x26   :  { %s3203_s30 = sld [smem:[%s3608_s0 + %s3073_s7]]   ;;  %s3077_s7 = smov 26  }
  0x27   :  { %s3208_s6 = sld [smem:[%s3608_s0 + %s3074_s15]]   ;;  %s3078_s15 = smov 27  }
  0x28   :  { %s3213_s19 = sld [smem:[%s3608_s0 + %s3075_s22]]   ;;  %s3079_s22 = smov 28  }
  0x29   :  { %s3218_s24 = sld [smem:[%s3608_s0 + %s3076_s28]]   ;;  %s3080_s28 = smov 29  }
  0x2a   :  { %s3223_s14 = sld [smem:[%s3608_s0 + %s3077_s7]]  }
  0x2b   :  { %s3228_s17 = sld [smem:[%s3608_s0 + %s3078_s15]]  }
  0x2c   :  { %s3233_s13 = sld [smem:[%s3608_s0 + %s3079_s22]]  }
  0x2d   :  { %s3238_s8 = sld [smem:[%s3608_s0 + %s3080_s28]]  }
  0x33   :  { %3634 = sst [smem:[#allocation22_spill]] %s3238_s8 }
  0x34   :  { %64 = vsyncpa [#allocation5], 0  ;;  %s3240_s7 = smov 0  }
  0x35 LB: > { %3635 = sst [smem:[#allocation23_spill]] %s3050_s7  ;;  %s3246_s10 = sadd.s32 4294967295, %s3050_s7   ;;  %s3050_s7 = sphi %s3240_s7, %s70_s7  }
  0x36   : > { %p2536_p0 = scmp.ge.s32.totalorder %s3050_s7, 1  ;;  %p911_p1 = scmp.lt.s32.totalorder %s3050_s7, 3 }
  0x38   : > { %p912_p2 = pnand %p2536_p0, %p911_p1 }
  0x39   : > { %p1025_p3 = scmp.lt.s32.totalorder (!%p912_p2), %s3246_s10, 1  ;;  %p2548_p4 = scmp.ne.s32.totalorder (!%p912_p2), %s3246_s10, 0 }
  0x3a   : > { %915 = sbr.rel (%p912_p2) target bundleno = 2477 (0x9ad), region = 136 }
  0x3f   : > { %s3252_s0 = scalar_select %p1025_p3, %s3246_s10, 1 }
  0x40   : > { %s3637_s18 = sld [smem:[#allocation7_spill]] (!%p2548_p4) }
  0x41   : > { %s2869_s11 = smul.u32 40, %s3252_s0  ;;  %s1032_s15 = scalar_lea.vmem %s3183_s12, %s3252_s0 }
  0x42   : > { %s2807_s16 = sshll.u32 %s3252_s0, 5  ;;  %s1048_s28 = scalar_lea.vmem %s3203_s30, %s3252_s0 }
  0x43   : > { %s3261_s22 = scalar_lea.vmem %s3178_s4, %s2869_s11  ;;  %s3264_s23 = scalar_lea.vmem %s3188_s20, %s2807_s16 }
  0x44   : > { %s3267_s26 = scalar_lea.vmem %s3198_s21, %s2807_s16  ;;  %s2809_s1 = sshll.u32 %s3252_s0, 6 }
  0x45   : > { %s1056_s2 = scalar_lea.vmem %s3213_s19, %s3252_s0  ;;  %s3275_s7 = scalar_lea.vmem %s3208_s6, %s2809_s1 }
  0x46   : > { %s3278_s8 = scalar_lea.vmem %s3218_s24, %s2807_s16  ;;  %s1064_s29 = scalar_lea.vmem %s3223_s14, %s3252_s0 }
  0x47   : > { %s3283_s5 = scalar_lea.vmem %s3228_s17, %s2807_s16  ;;  %1077 = sbr.rel (%p2548_p4) target bundleno = 240 (0xf0), region = 140 }
  0x48   : > { %s3636_s11 = sld [smem:[#allocation8_spill]] (!%p2548_p4) }
  0x49   : > { %s3638_s1 = sld [smem:[#allocation12_spill]] (!%p2548_p4) }
  0x4a   : > { %s3639_s16 = sld [smem:[#allocation13_spill]] (!%p2548_p4) }
  0x4c   : > { %v1141_v0 = vld [vmem:[%s3128_s3] sm:$0xf]  ;;  %vm1171_vm0 = vcmask 1043456   ;;  %v2813_v4 = vld [vmem:[%s3637_s18 + $0x8] sm:$0xff]  ;;  %vm1161_vm1 = vcmask 64512   ;;  %vm1104_vm2 = vcmask 130048  }
  0x4d   : > { %v2814_v1 = vld [vmem:[%s3118_s25] sm:$0xff]  ;;  %v1173_v2 = vsel %vm1171_vm0, %v1141_v0, 0  ;;  %vm1130_vm3 = vcmask 261120  }
  0x4e   : > { %v2816_v3 = vld [vmem:[%s3636_s11 + $0x8] sm:$0xff]  ;;  %2866 = vmatpush.bf16.msra.mxu2 %v1173_v2  ;;  %2865 = vmatpush.bf16.msra.mxu3 %v2814_v1  ;;  %v2812_v5 = vld [vmem:[%s3637_s18] sm:$0xff]  ;;  %v2817_v7 = vld [vmem:[%s3636_s11 + $0x10] sm:$0xff] }
  0x4f   : > { %v2815_v6 = vld [vmem:[%s3636_s11] sm:$0xff]  ;;  %1118 = vmatpush.bf16.msra.mxu0 %v2814_v1  ;;  %1182 = vmatpush.bf16.msra.mxu1 %v1173_v2 }
  0x50   : > { %v2919_v8 = vld [vmem:[%s3638_s1] ss:$0 sm:$0xff] }
  0x51   : > { %2576 = vmatmul.msk.bf16.vlgmr.msra.gmra.mxu2 %vm1161_vm1, %v2816_v3  ;;  %2562 = vmatmul.msk.bf16.vlgmr.msra.gmra.mxu3 %vm1104_vm2, %v2813_v4  ;;  %v2918_v9 = vld [vmem:[%s3639_s16] ss:$0 sm:$0xff] }
  0x52   : > { %2561 = vmatmul.msk.bf16.vlgmr.msra.gmra.mxu0 %vm1104_vm2, %v2812_v5  ;;  %2575 = vmatmul.msk.bf16.vlgmr.msra.gmra.mxu1 %vm1161_vm1, %v2815_v6 }
  0x61   : > { %2577 = vmatmul.msk.bf16.gmra.mxu2 %vm1161_vm1, %v2817_v7 }
  0xcf   : > { %v1120_v10 = vpop.f32.mrf.mxu0  ;;  %v1184_v11 = vpop.f32.mrf.mxu1 }
  0xd0   : > { %v1121_v12 = vadd.f32 %v2919_v8, %v1120_v10  ;;  %v1185_v13 = vadd.f32 %v2918_v9, %v1184_v11 }
  0xd2   : > { %1131 = vst.msk [vmem:[#allocation2] sm:$0xff] %vm1130_vm3, %v1121_v12 }
  0xd3   : > { %1199 = vst.msk [vmem:[#allocation3] sm:$0xff] %vm1104_vm2, %v1185_v13 }
  0xd4   : > { %v1189_v14 = vpop.f32.mrf.mxu2  ;;  %v1125_v15 = vpop.f32.mrf.mxu3 }
  0xd5   : > { %v1190_v16 = vadd.f32 %v2918_v9, %v1189_v14  ;;  %v1126_v17 = vadd.f32 %v2919_v8, %v1125_v15 }
  0xd7   : > { %1201 = vst.msk [vmem:[#allocation3 + $0x10] sm:$0xff] %vm1104_vm2, %v1190_v16  ;;  %v1122_v18 = vpop.f32.mrf.mxu0  ;;  %v1186_v19 = vpop.f32.mrf.mxu1 }
  0xd8   : > { %1133 = vst.msk [vmem:[#allocation2 + $0x10] sm:$0xff] %vm1130_vm3, %v1126_v17  ;;  %v1123_v20 = vadd.f32 %v2919_v8, %v1122_v18  ;;  %v1187_v21 = vadd.f32 %v2918_v9, %v1186_v19 }
  0xda   : > { %1132 = vst.msk [vmem:[#allocation2 + $0x8] sm:$0xff] %vm1130_vm3, %v1123_v20 }
  0xdb   : > { %1200 = vst.msk [vmem:[#allocation3 + $0x8] sm:$0xff] %vm1104_vm2, %v1187_v21 }
  0xdc   : > { %v1191_v22 = vpop.f32.mrf.mxu2  ;;  %v1127_v23 = vpop.f32.mrf.mxu3 }
  0xdd   : > { %v1192_v24 = vadd.f32 %v2918_v9, %v1191_v22  ;;  %v1128_v25 = vadd.f32 %v2919_v8, %v1127_v23 }
  0xdf   : > { %1202 = vst.msk [vmem:[#allocation3 + $0x18] sm:$0xff] %vm1104_vm2, %v1192_v24 }
  0xe0   : > { %1134 = vst.msk [vmem:[#allocation2 + $0x18] sm:$0xff] %vm1130_vm3, %v1128_v25 }
  0xe4   : > { %v1194_v26 = vpop.f32.mrf.mxu2 }
  0xe5   : > { %v1195_v27 = vadd.f32 %v2918_v9, %v1194_v26 }
  0xe7   : > { %1203 = vst.msk [vmem:[#allocation3 + $0x20] sm:$0xff] %vm1104_vm2, %v1195_v27 }
  0xec   : > { %v1196_v28 = vpop.f32.mrf.mxu2 }
  0xed   : > { %v1197_v29 = vadd.f32 %v2918_v9, %v1196_v28 }
  0xef   : > { %1204 = vst.msk [vmem:[#allocation3 + $0x28] sm:$0xff] %vm1104_vm2, %v1197_v29 }
  0xf0 PF: > { %v3309_v30 = vld [vmem:[#allocation2 + $0x10] sm:$0xff]  ;;  %s3640_s1 = sld [smem:[#allocation9_spill]]  ;;  %v3311_v31 = vld [vmem:[#allocation2 + $0x18] sm:$0xff]  ;;  %v3313_v32 = vld [vmem:[#allocation2] sm:$0xff]  ;;  %vm1253_vm4 = vcmask 261120   ;;  %s3081_s16 = smov 32  }
  0xf1   : > { %v3317_v33 = vpack.c.bf16 %v3311_v31, %v3309_v30  ;;  %v3319_v34 = vld [vmem:[#allocation2 + $0x8] sm:$0xff]  ;;  %v1311_v51 = vld [vmem:[#allocation3] sm:$0xff]  ;;  %s3082_s9 = smov 64   ;;  %v2827_v56 = vld [vmem:[%s3261_s22 + $0x18] sm:$0xff]  ;;  %vm1371_vm5 = vcmask 523264   ;;  %vm1425_vm6 = vcmask 654336  }
  0xf2   : > { %v3324_v35 = vpack.c.bf16 %v3319_v34, %v3313_v32  ;;  %v1312_v52 = vld [vmem:[#allocation3 + $0x8] sm:$0xff]  ;;  %v2828_v55 = vld [vmem:[%s3261_s22 + $0x20] sm:$0xff]  ;;  %v1313_v59 = vld [vmem:[#allocation3 + $0x10] sm:$0xff]  ;;  %vm1643_vm7 = vcmask 785408   ;;  %p2743_p5 = scmp.ne.s32.totalorder %s3246_s10, 1 }
  0xf3   : > { %1278 = vmatpush.bf16.msra.mxu0 %v3317_v33  ;;  %v2925_v53 = vpack.i.bf16 %v1312_v52, %v1311_v51  ;;  %1438 = vmatpush.bf16.msra.mxu1 %v2828_v55  ;;  %v1314_v60 = vld [vmem:[#allocation3 + $0x18] sm:$0xff]  ;;  %v1315_v1 = vld [vmem:[#allocation3 + $0x20] sm:$0xff]  ;;  %v2826_v4 = vld [vmem:[%s3261_s22 + $0x10] sm:$0xff] }
  0xf4   : > { %v2935_v61 = vpack.i.bf16 %v1314_v60, %v1313_v59  ;;  %v2825_v5 = vld [vmem:[%s3261_s22 + $0x8] sm:$0xff]  ;;  %v2824_v6 = vld [vmem:[%s3261_s22] sm:$0xff]  ;;  %v2831_v55 = vld [vmem:[%s3264_s23 + $0x10] sm:$0xff]  ;;  %s3642_s22 = sld [smem:[#allocation10_spill]] }
  0xf6   : > { %v3327_v36 = vld [vmem:[%s3640_s1] sm:$0xff]  ;;  %v3335_v37 = vld [vmem:[%s3640_s1 + $0x8] sm:$0xff]  ;;  %v3340_v38 = vld [vmem:[%s3640_s1 + $0x10] sm:$0xff] }
  0xf7   : > { %1279 = vmatpush.bf16.msra.mxu0 %v3324_v35  ;;  %v3345_v39 = vld [vmem:[%s3640_s1 + $0x18] sm:$0xff]  ;;  %v3350_v40 = vld [vmem:[%s3640_s1 + $0x20] sm:$0xff]  ;;  %v3355_v41 = vld [vmem:[%s3640_s1 + $0x28] sm:$0xff]  ;;  %1439 = vmatpush.bf16.msra.mxu1 %v2827_v56 }
  0xf8   : > { %v1316_v2 = vld [vmem:[#allocation3 + $0x28] sm:$0xff] }
  0xf9   : > { %v2945_v3 = vpack.i.bf16 %v1316_v2, %v1315_v1  ;;  %v2830_v56 = vld [vmem:[%s3264_s23 + $0x8] sm:$0xff]  ;;  %v2835_v2 = vld [vmem:[%s3267_s26 + $0x10] sm:$0xff] }
  0xfa   : > { %2602 = vmatmul.msk.bf16.vlgmr.msra.gmra.mxu0 %vm1253_vm4, %v3327_v36 }
  0xfb   : > { %1748 = vmatpush.bf16.msrb.mxu0 %v3317_v33  ;;  %1440 = vmatpush.bf16.msra.mxu1 %v2826_v4 }
  0xff   : > { %1749 = vmatpush.bf16.msrb.mxu0 %v3324_v35  ;;  %1441 = vmatpush.bf16.msra.mxu1 %v2825_v5 }
 0x103   : > { %1442 = vmatpush.bf16.msra.mxu1 %v2824_v6 }
 0x107   : > { %2867 = vmatpush.bf16.msrb.mxu1 %v3317_v33 }
 0x10a   : > { %2603 = vmatmul.msk.bf16.gmra.mxu0 %vm1253_vm4, %v3335_v37 }
 0x10b   : > { %2868 = vmatpush.bf16.msrb.mxu1 %v3324_v35 }
 0x11a   : > { %2604 = vmatmul.msk.bf16.gmra.mxu0 %vm1253_vm4, %v3340_v38 }
 0x12a   : > { %2605 = vmatmul.msk.bf16.gmra.mxu0 %vm1253_vm4, %v3345_v39 }
 0x13a   : > { %2606 = vmatmul.msk.bf16.gmra.mxu0 %vm1253_vm4, %v3350_v40 }
 0x14a   : > { %2607 = vmatmul.msk.bf16.gmra.mxu0 %vm1253_vm4, %v3355_v41 }
 0x177   : > { %v1281_v42 = vpop.f32.mrf.mxu0 }
 0x17f   : > { %v1283_v43 = vpop.f32.mrf.mxu0 }
 0x187   : > { %v3359_v44 = vpop.f32.mrf.mxu0 }
 0x18f   : > { %v3361_v45 = vpop.f32.mrf.mxu0 }
 0x197   : > { %v3363_v46 = vpop.f32.mrf.mxu0 }
 0x19f   : > { %v3365_v47 = vpop.f32.mrf.mxu0 }
 0x1a7   : > { %v1296_v48 = vpop.f32.mrf.mxu0 }
 0x1af   : > { %v1298_v49 = vpop.f32.mrf.mxu0 }
 0x1b0   : > { %v2920_v50 = vpack.i.bf16 %v1298_v49, %v1296_v48 }
 0x1b2   : > { %2921 = vrot.lane.b32.xlu0 %v2920_v50, %s3081_s16 }
 0x1b7   : > { %v1301_v54 = vpop.f32.mrf.mxu0 }
 0x1ba   : > { %2926 = vrot.lane.b32.xlu0 %v2925_v53, %s3082_s9 }
 0x1bf   : > { %v1303_v57 = vpop.f32.mrf.mxu0 }
 0x1c0   : > { %v2930_v58 = vpack.i.bf16 %v1303_v57, %v1301_v54  ;;  %v2832_v54 = vld [vmem:[%s3264_s23 + $0x18] sm:$0xff]  ;;  %v2829_v57 = vld [vmem:[%s3264_s23] sm:$0xff]  ;;  %s3083_s23 = smov 96  }
 0x1c1   : > { %1517 = vmatpush.bf16.msra.mxu2 %v2832_v54 }
 0x1c2   : > { %2931 = vrot.lane.b32.xlu1 %v2930_v58, %s3081_s16 }
 0x1c5   : > { %1518 = vmatpush.bf16.msra.mxu2 %v2831_v55 }
 0x1c7   : > { %v1306_v62 = vpop.f32.mrf.mxu0 }
 0x1c9   : > { %1519 = vmatpush.bf16.msra.mxu2 %v2830_v56 }
 0x1ca   : > { %2936 = vrot.lane.b32.xlu1 %v2935_v61, %s3082_s9 }
 0x1cd   : > { %1520 = vmatpush.bf16.msra.mxu2 %v2829_v57  ;;  %v2972_v57 = vld [vmem:[%s1048_s28] ss:$0 sm:$0xff]  ;;  %s3656_s28 = sld [smem:[#allocation11_spill]] (!%p2743_p5) }
 0x1cf   : > { %v1308_v63 = vpop.f32.mrf.mxu0 }
 0x1d0   : > { %v2940_v0 = vpack.i.bf16 %v1308_v63, %v1306_v62 }
 0x1d2   : > { %2941 = vrot.lane.b32.xlu2 %v2940_v0, %s3081_s16  ;;  %v2836_v0 = vld [vmem:[%s3267_s26 + $0x18] sm:$0xff]  ;;  %s3658_s16 = sld [smem:[#allocation19_spill]] (!%p2743_p5) }
 0x1d3   : > { %1595 = vmatpush.bf16.msra.mxu3 %v2836_v0 }
 0x1d7   : > { %1596 = vmatpush.bf16.msra.mxu3 %v2835_v2 }
 0x1da   : > { %2946 = vrot.lane.b32.xlu2 %v2945_v3, %s3082_s9  ;;  %v2834_v3 = vld [vmem:[%s3267_s26 + $0x8] sm:$0xff] }
 0x1db   : > { %1597 = vmatpush.bf16.msra.mxu3 %v2834_v3 }
 0x224   : > { %v2922_v7 = vpop.permute.xlu0 %2921 }
 0x225   : > { %v2924_v8 = vunpack.i.h.bf16 %v2922_v7  ;;  %v2923_v9 = vunpack.i.l.bf16 %v2922_v7  ;;  %v2833_v7 = vld [vmem:[%s3267_s26] sm:$0xff]  ;;  %s3649_s26 = sld [smem:[#allocation17_spill]] (!%p2743_p5) }
 0x226   : > { %1598 = vmatpush.bf16.msra.mxu3 %v2833_v7 }
 0x227   : > { %v1366_v13 = vsel %vm1253_vm4, %v1283_v43, %v2924_v8  ;;  %v1365_v14 = vsel %vm1253_vm4, %v1281_v42, %v2923_v9 }
 0x22c   : > { %v2927_v10 = vpop.permute.xlu0 %2926  ;;  %v2942_v21 = vpop.permute.xlu2 %2941 }
 0x22d   : > { %v2929_v11 = vunpack.i.h.bf16 %v2927_v10  ;;  %v2928_v12 = vunpack.i.l.bf16 %v2927_v10  ;;  %v2944_v43 = vunpack.i.h.bf16 %v2942_v21  ;;  %v2943_v48 = vunpack.i.l.bf16 %v2942_v21 }
 0x22f   : > { %v1372_v15 = vsel %vm1371_vm5, %v1365_v14, %v2928_v12  ;;  %v1373_v16 = vsel %vm1371_vm5, %v1366_v13, %v2929_v11 }
 0x230   : > { %v1378_v17 = vpack.c.bf16 %v1373_v16, %v1372_v15 }
 0x232   : > { %2628 = vmatmul.msk.bf16.vlgmr.msra.gmra.mxu1 %vm1425_vm6, %v1378_v17 }
 0x234   : > { %v2932_v18 = vpop.permute.xlu1 %2931  ;;  %v2947_v42 = vpop.permute.xlu2 %2946 }
 0x235   : > { %v2934_v19 = vunpack.i.h.bf16 %v2932_v18  ;;  %v2933_v20 = vunpack.i.l.bf16 %v2932_v18  ;;  %v2949_v49 = vunpack.i.h.bf16 %v2947_v42  ;;  %v2948_v50 = vunpack.i.l.bf16 %v2947_v42 }
 0x236   : > { %v1677_v18 = vsel %vm1253_vm4, %v3317_v33, 0 }
 0x237   : > { %v1368_v25 = vsel %vm1253_vm4, %v3361_v45, %v2934_v19  ;;  %v1367_v26 = vsel %vm1253_vm4, %v3359_v44, %v2933_v20  ;;  %v1370_v44 = vsel %vm1253_vm4, %v3365_v47, %v2944_v43  ;;  %v1369_v45 = vsel %vm1253_vm4, %v3363_v46, %v2943_v48  ;;  %v2970_v46 = vld [vmem:[%s1032_s15] ss:$0 sm:$0xff]  ;;  %1685 = vmatpush.bf16.xpose.msrb.mxu3 %v1677_v18  ;;  %s3641_s15 = scalar_lea.vmem %s3193_s27, %s3252_s0 }
 0x238   : > { %v1376_v51 = vsel %vm1371_vm5, %v1369_v45, %v2948_v50  ;;  %v1377_v52 = vsel %vm1371_vm5, %v1370_v44, %v2949_v49  ;;  %v1674_v19 = vsel %vm1253_vm4, %v3324_v35, 0 }
 0x239   : > { %v1380_v53 = vpack.c.bf16 %v1377_v52, %v1376_v51 }
 0x23c   : > { %v2937_v22 = vpop.permute.xlu1 %2936 }
 0x23d   : > { %v2939_v23 = vunpack.i.h.bf16 %v2937_v22  ;;  %v2938_v24 = vunpack.i.l.bf16 %v2937_v22 }
 0x23f   : > { %v1374_v27 = vsel %vm1371_vm5, %v1367_v26, %v2938_v24  ;;  %v1375_v28 = vsel %vm1371_vm5, %v1368_v25, %v2939_v23  ;;  %1686 = vmatpush.bf16.xpose.msrb.mxu3 %v1674_v19 }
 0x240   : > { %v1379_v29 = vpack.c.bf16 %v1375_v28, %v1374_v27  ;;  %v2971_v28 = vld [vmem:[%s3641_s15] ss:$0 sm:$0xff]  ;;  %s3659_s15 = sld [smem:[#allocation21_spill]] (!%p2743_p5) }
 0x242   : > { %2629 = vmatmul.msk.bf16.gmra.mxu1 %vm1425_vm6, %v1379_v29 }
 0x252   : > { %2630 = vmatmul.msk.bf16.gmra.mxu1 %vm1425_vm6, %v1380_v53 }
 0x2af   : > { %v1444_v47 = vpop.f32.mrf.mxu1 }
 0x2b0   : > { %v1445_v58 = vadd.f32 %v2970_v46, %v1444_v47 }
 0x2b2   : > { %v1459_v61 = vmax.f32 %v1445_v58, 0.0 }
 0x2b7   : > { %v1446_v59 = vpop.f32.mrf.mxu1 }
 0x2b8   : > { %v1447_v60 = vadd.f32 %v2970_v46, %v1446_v59 }
 0x2ba   : > { %v1460_v62 = vmax.f32 %v1447_v60, 0.0 }
 0x2bc   : > { %v1465_v63 = vpack.c.bf16 %v1460_v62, %v1459_v61 }
 0x2be   : > { %1552 = vrot.lane.b32.xlu0 %v1465_v63, %s3082_s9  ;;  %2647 = vmatmul.msk.bf16.vlgmr.msra.gmra.mxu2 %vm1371_vm5, %v1465_v63 }
 0x2bf   : > { %v1449_v1 = vpop.f32.mrf.mxu1 }
 0x2c0   : > { %v1450_v4 = vadd.f32 %v2970_v46, %v1449_v1 }
 0x2c2   : > { %v1461_v8 = vmax.f32 %v1450_v4, 0.0 }
 0x2c7   : > { %v1451_v5 = vpop.f32.mrf.mxu1 }
 0x2c8   : > { %v1452_v6 = vadd.f32 %v2970_v46, %v1451_v5  ;;  %v1670_v5 = vld [vmem:[%s3642_s22 + $0x8] sm:$0xff] }
 0x2ca   : > { %v1462_v9 = vmax.f32 %v1452_v6, 0.0 }
 0x2cc   : > { %v1466_v10 = vpack.c.bf16 %v1462_v9, %v1461_v8  ;;  %v1671_v9 = vld [vmem:[%s3642_s22 + $0x10] sm:$0xff] }
 0x2ce   : > { %1554 = vrot.lane.b32.xlu1 %v1466_v10, %s3082_s9  ;;  %2648 = vmatmul.msk.bf16.gmra.mxu2 %vm1371_vm5, %v1466_v10 }
 0x2cf   : > { %v1454_v11 = vpop.f32.mrf.mxu1 }
 0x2d0   : > { %v1455_v12 = vadd.f32 %v2970_v46, %v1454_v11 }
 0x2d2   : > { %v1463_v15 = vmax.f32 %v1455_v12, 0.0 }
 0x2d7   : > { %v1456_v13 = vpop.f32.mrf.mxu1 }
 0x2d8   : > { %v1457_v14 = vadd.f32 %v2970_v46, %v1456_v13  ;;  %v1672_v13 = vld [vmem:[%s3642_s22 + $0x18] sm:$0xff] }
 0x2da   : > { %v1464_v16 = vmax.f32 %v1457_v14, 0.0 }
 0x2dc   : > { %v1467_v17 = vpack.c.bf16 %v1464_v16, %v1463_v15 }
 0x2de   : > { %1556 = vrot.lane.b32.xlu2 %v1467_v17, %s3082_s9  ;;  %2649 = vmatmul.msk.bf16.gmra.mxu2 %vm1371_vm5, %v1467_v17 }
 0x330   : > { %v1553_v20 = vpop.permute.xlu0 %1552 }
 0x331   : > { %2666 = vmatmul.msk.bf16.vlgmr.msra.gmra.mxu3 %vm1371_vm5, %v1553_v20 }
 0x338   : > { %v1557_v24 = vpop.permute.xlu2 %1556 }
 0x340   : > { %v1555_v21 = vpop.permute.xlu1 %1554 }
 0x341   : > { %v1522_v22 = vpop.f32.mrf.mxu2  ;;  %2667 = vmatmul.msk.bf16.gmra.mxu3 %vm1371_vm5, %v1555_v21 }
 0x342   : > { %v1523_v51 = vadd.f32 %v2971_v28, %v1522_v22 }
 0x349   : > { %v1524_v23 = vpop.f32.mrf.mxu2 }
 0x34a   : > { %v1525_v44 = vadd.f32 %v2971_v28, %v1524_v23 }
 0x351   : > { %v1527_v25 = vpop.f32.mrf.mxu2  ;;  %2668 = vmatmul.msk.bf16.gmra.mxu3 %vm1371_vm5, %v1557_v24 }
 0x352   : > { %v1528_v50 = vadd.f32 %v2971_v28, %v1527_v25 }
 0x359   : > { %v1529_v26 = vpop.f32.mrf.mxu2 }
 0x35a   : > { %v1530_v48 = vadd.f32 %v2971_v28, %v1529_v26 }
 0x35c   : > { %v1619_v45 = vpack.c.bf16 %v1530_v48, %v1528_v50 }
 0x361   : > { %v1532_v27 = vpop.f32.mrf.mxu2  ;;  %2671 = vmatmul.msk.bf16.vlgmr.msrb.gmra.mxu3 %vm1253_vm4, %v3324_v35  ;;  %v1618_v35 = vpack.c.bf16 %v1525_v44, %v1523_v51  ;;  %v2955_v51 = vpack.i.bf16 %v3319_v34, %v3313_v32 }
 0x362   : > { %v1533_v42 = vadd.f32 %v2971_v28, %v1532_v27 }
 0x369   : > { %v1534_v29 = vpop.f32.mrf.mxu2 }
 0x36a   : > { %v1535_v43 = vadd.f32 %v2971_v28, %v1534_v29 }
 0x36c   : > { %v1620_v49 = vpack.c.bf16 %v1535_v43, %v1533_v42 }
 0x36e   : > { %1652 = vmatpush.bf16.msrb.mxu2 %v1620_v49 }
 0x371   : > { %2672 = vmatmul.msk.bf16.gmra.mxu3 %vm1253_vm4, %v3317_v33  ;;  %v1669_v33 = vld [vmem:[%s3642_s22] sm:$0xff] }
 0x372   : > { %1653 = vmatpush.bf16.msrb.mxu2 %v1619_v45 }
 0x376   : > { %1654 = vmatpush.bf16.msrb.mxu2 %v1618_v35  ;;  %v2844_v35 = vld [vmem:[%s3275_s7 + $0x38] sm:$0xff] }
 0x3b4   : > { %v1600_v52 = vpop.f32.mrf.mxu3 }
 0x3b5   : > { %v1601_v1 = vadd.f32 %v2972_v57, %v1600_v52 }
 0x3bc   : > { %v1602_v53 = vpop.f32.mrf.mxu3 }
 0x3bd   : > { %v1603_v62 = vadd.f32 %v2972_v57, %v1602_v53  ;;  %v2843_v53 = vld [vmem:[%s3275_s7 + $0x30] sm:$0xff] }
 0x3bf   : > { %v1615_v4 = vpack.c.bf16 %v1603_v62, %v1601_v1 }
 0x3c4   : > { %v1605_v54 = vpop.f32.mrf.mxu3 }
 0x3c5   : > { %v1606_v61 = vadd.f32 %v2972_v57, %v1605_v54  ;;  %v2965_v54 = vpack.i.bf16 %v3311_v31, %v3309_v30 }
 0x3cc   : > { %v1607_v55 = vpop.f32.mrf.mxu3 }
 0x3cd   : > { %v1608_v59 = vadd.f32 %v2972_v57, %v1607_v55  ;;  %v2842_v55 = vld [vmem:[%s3275_s7 + $0x28] sm:$0xff] }
 0x3cf   : > { %v1616_v63 = vpack.c.bf16 %v1608_v59, %v1606_v61 }
 0x3d4   : > { %v1610_v56 = vpop.f32.mrf.mxu3 }
 0x3d5   : > { %v1611_v46 = vadd.f32 %v2972_v57, %v1610_v56 }
 0x3dc   : > { %v1612_v47 = vpop.f32.mrf.mxu3 }
 0x3dd   : > { %v1613_v58 = vadd.f32 %v2972_v57, %v1612_v47 }
 0x3df   : > { %v1617_v60 = vpack.c.bf16 %v1613_v58, %v1611_v46 }
 0x3e1   : > { %1655 = vmatpush.bf16.msrb.mxu2 %v1617_v60 }
 0x3e4   : > { %v1688_v0 = vpop.f32.mrf.mxu3 }
 0x3e5   : > { %v1689_v2 = vadd.f32 %v1688_v0, %v1669_v33  ;;  %1656 = vmatpush.bf16.msrb.mxu2 %v1616_v63 }
 0x3e7   : > { %v1698_v3 = vsel %vm1253_vm4, %v1689_v2, -inf }
 0x3e8   : > { %1699 = vmax.xlane.f32.xlu0 %v1698_v3 }
 0x3e9   : > { %1657 = vmatpush.bf16.msrb.mxu2 %v1615_v4 }
 0x3ec   : > { %v1690_v6 = vpop.f32.mrf.mxu3 }
 0x3ed   : > { %v1691_v7 = vadd.f32 %v1690_v6, %v1670_v5  ;;  %1883 = vmatpush.bf16.msra.mxu2 %v2844_v35 }
 0x3ef   : > { %v1701_v8 = vsel %vm1253_vm4, %v1691_v7, -inf }
 0x3f0   : > { %1702 = vmax.xlane.f32.xlu1 %v1701_v8  ;;  %v2841_v8 = vld [vmem:[%s3275_s7 + $0x20] sm:$0xff] }
 0x3f1   : > { %1884 = vmatpush.bf16.msra.mxu2 %v2843_v53 }
 0x3f4   : > { %v1693_v10 = vpop.f32.mrf.mxu3 }
 0x3f5   : > { %v1694_v11 = vadd.f32 %v1693_v10, %v1671_v9  ;;  %1885 = vmatpush.bf16.msra.mxu2 %v2842_v55  ;;  %v2840_v9 = vld [vmem:[%s3275_s7 + $0x18] sm:$0xff]  ;;  %v2839_v10 = vld [vmem:[%s3275_s7 + $0x10] sm:$0xff] }
 0x3f7   : > { %v1704_v12 = vsel %vm1253_vm4, %v1694_v11, -inf }
 0x3f8   : > { %1705 = vmax.xlane.f32.xlu2 %v1704_v12  ;;  %v2837_v12 = vld [vmem:[%s3275_s7] sm:$0xff] }
 0x3f9   : > { %1886 = vmatpush.bf16.msra.mxu2 %v2841_v8 }
 0x3fc   : > { %v1695_v14 = vpop.f32.mrf.mxu3 }
 0x3fd   : > { %v1696_v15 = vadd.f32 %v1695_v14, %v1672_v13  ;;  %1887 = vmatpush.bf16.msra.mxu2 %v2840_v9  ;;  %v2848_v14 = vld [vmem:[%s3278_s8 + $0x18] sm:$0xff] }
 0x3fe   : > { %1954 = vmatpush.bf16.msra.mxu3 %v2848_v14 }
 0x3ff   : > { %v1707_v16 = vsel %vm1253_vm4, %v1696_v15, -inf }
 0x400   : > { %1708 = vmax.xlane.f32.xlu2 %v1707_v16 }
 0x401   : > { %1888 = vmatpush.bf16.msra.mxu2 %v2839_v10 }
 0x411   : > { %1627 = vxpose.xlu0.c.b16.start [1/6] (short) (narrow) %v3327_v36, 32 }
 0x421   : > { %1628 = vxpose.xlu0.c.b16.cont [2/6] (short) (narrow) %v3335_v37, 32 }
 0x431   : > { %1629 = vxpose.xlu0.c.b16.cont [3/6] (short) (narrow) %v3340_v38, 32 }
 0x441   : > { %1630 = vxpose.xlu0.c.b16.cont [4/6] (short) (narrow) %v3345_v39, 32 }
 0x451   : > { %1631 = vxpose.xlu0.c.b16.cont [5/6] (short) (narrow) %v3350_v40, 32 }
 0x45b   : > { %v1700_v17 = vpop.xlane.xlu0 %1699 }
 0x45c   : > { %v1710_v18 = vsub.f32 %v1689_v2, %v1700_v17  ;;  %v2846_v17 = vld [vmem:[%s3278_s8 + $0x8] sm:$0xff] }
 0x45e   : > { %v1714_v19 = vmul.f32 1.442695, %v1710_v18 }
 0x460   : > { %2976 = vpow2.f32 %v1714_v19 }
 0x461   : > { %1632 = vxpose.xlu0.c.b16.end [6/6] (short) (narrow) %v3355_v41, 32 }
 0x463   : > { %v1703_v20 = vpop.xlane.xlu1 %1702 }
 0x464   : > { %v1711_v21 = vsub.f32 %v1691_v7, %v1703_v20 }
 0x466   : > { %v2977_v22 = vpop.eup %2976  ;;  %v1716_v23 = vmul.f32 1.442695, %v1711_v21 }
 0x467   : > { %v1722_v36 = vsel %vm1253_vm4, %v2977_v22, 0.0 }
 0x468   : > { %2978 = vpow2.f32 %v1716_v23  ;;  %1723 = vadd.xlane.f32.xlu1 %v1722_v36 }
 0x46b   : > { %v1706_v37 = vpop.xlane.xlu2 %1705 }
 0x46c   : > { %v1712_v38 = vsub.f32 %v1694_v11, %v1706_v37  ;;  %v2838_v11 = vld [vmem:[%s3275_s7 + $0x8] sm:$0xff]  ;;  %s3647_s7 = sld [smem:[#allocation18_spill]] (!%p2743_p5) }
 0x46d   : > { %1889 = vmatpush.bf16.msra.mxu2 %v2838_v11 }
 0x46e   : > { %v2979_v24 = vpop.eup %2978  ;;  %v1718_v39 = vmul.f32 1.442695, %v1712_v38 }
 0x46f   : > { %v1725_v40 = vsel %vm1253_vm4, %v2979_v24, 0.0  ;;  %v1734_v25 = vpack.c.bf16 %v2979_v24, %v2977_v22 }
 0x470   : > { %2980 = vpow2.f32 %v1718_v39  ;;  %1726 = vadd.xlane.f32.xlu2 %v1725_v40 }
 0x471   : > { %2673 = vmatmul.msk.bf16.vlgmr.msrb.gmra.mxu0 %vm1253_vm4, %v1734_v25  ;;  %1890 = vmatpush.bf16.msra.mxu2 %v2837_v12 }
 0x473   : > { %v1709_v41 = vpop.xlane.xlu2 %1708 }
 0x474   : > { %v1713_v26 = vsub.f32 %v1696_v15, %v1709_v41  ;;  %v2847_v15 = vld [vmem:[%s3278_s8 + $0x10] sm:$0xff] }
 0x475   : > { %1955 = vmatpush.bf16.msra.mxu3 %v2847_v15 }
 0x476   : > { %v2981_v27 = vpop.eup %2980  ;;  %v1720_v28 = vmul.f32 1.442695, %v1713_v26 }
 0x477   : > { %v1728_v29 = vsel %vm1253_vm4, %v2981_v27, 0.0 }
 0x478   : > { %2982 = vpow2.f32 %v1720_v28  ;;  %1729 = vadd.xlane.f32.xlu1 %v1728_v29 }
 0x479   : > { %1956 = vmatpush.bf16.msra.mxu3 %v2846_v17 }
 0x47e   : > { %v2983_v42 = vpop.eup %2982 }
 0x47f   : > { %v1731_v43 = vsel %vm1253_vm4, %v2983_v42, 0.0  ;;  %v1735_v48 = vpack.c.bf16 %v2983_v42, %v2981_v27 }
 0x480   : > { %1732 = vadd.xlane.f32.xlu2 %v1731_v43 }
 0x481   : > { %2674 = vmatmul.msk.bf16.vlgmr.msrb.gmra.mxu1 %vm1253_vm4, %v1735_v48 }
 0x498   : > { %2956 = vrot.lane.b32.xlu2 %v2955_v51, %s3083_s23  ;;  %v2852_v51 = vld [vmem:[%s3283_s5 + $0x18] sm:$0xff] }
 0x499   : > { %2021 = vmatpush.bf16.msra.mxu1 %v2852_v51 }
 0x4a0   : > { %2966 = vrot.lane.b32.xlu2 %v2965_v54, %s3083_s23 }
 0x4bd   : > { %v1635_v49 = vpop.trf.xlu0 }
 0x4be   : > { %2669 = vmatmul.msk.bf16.vlgmr.msrb.gmra.mxu2 %vm1643_vm7, %v1635_v49 }
 0x4cd   : > { %v1636_v50 = vpop.trf.xlu0 }
 0x4ce   : > { %2670 = vmatmul.msk.bf16.gmra.mxu2 %vm1643_vm7, %v1636_v50 }
 0x4db   : > { %v1724_v44 = vpop.xlane.xlu1 %1723 }
 0x4dc   : > { %2984 = vrcp.f32 %v1724_v44 }
 0x4e2   : > { %v2985_v56 = vpop.eup %2984 }
 0x4e3   : > { %v1727_v45 = vpop.xlane.xlu2 %1726 }
 0x4e4   : > { %2986 = vrcp.f32 %v1727_v45  ;;  %v2845_v45 = vld [vmem:[%s3278_s8] sm:$0xff]  ;;  %s3646_s8 = sld [smem:[#allocation15_spill]] (!%p2743_p5) }
 0x4e5   : > { %1957 = vmatpush.bf16.msra.mxu3 %v2845_v45 }
 0x4ea   : > { %v2987_v47 = vpop.eup %2986 }
 0x4eb   : > { %v1730_v61 = vpop.xlane.xlu1 %1729 }
 0x4ec   : > { %2988 = vrcp.f32 %v1730_v61 }
 0x4ee   : > { %v1751_v52 = vpop.f32.mrf.mxu0 }
 0x4ef   : > { %v1765_v57 = vmul.f32 %v2985_v56, %v1751_v52  ;;  %v2973_v52 = vld [vmem:[%s1056_s2] ss:$0 sm:$0xff]  ;;  %s3657_s2 = sld [smem:[#allocation20_spill]] (!%p2743_p5) }
 0x4f1   : > { %v1769_v59 = vsub.f32 %v3313_v32, %v1765_v57 }
 0x4f2   : > { %v2989_v0 = vpop.eup %2988 }
 0x4f3   : > { %v1733_v62 = vpop.xlane.xlu2 %1732 }
 0x4f4   : > { %2990 = vrcp.f32 %v1733_v62 }
 0x4f6   : > { %v1753_v46 = vpop.f32.mrf.mxu0 }
 0x4f7   : > { %v1766_v58 = vmul.f32 %v2987_v47, %v1753_v46 }
 0x4f9   : > { %v1770_v60 = vsub.f32 %v3319_v34, %v1766_v58 }
 0x4fa   : > { %v2991_v2 = vpop.eup %2990 }
 0x4fb   : > { %v2950_v33 = vpack.i.bf16 %v1770_v60, %v1769_v59  ;;  %v2957_v16 = vpop.permute.xlu2 %2956 }
 0x4fc   : > { %v2959_v20 = vunpack.i.h.bf16 %v2957_v16  ;;  %v2958_v21 = vunpack.i.l.bf16 %v2957_v16 }
 0x4fd   : > { %2951 = vrot.lane.b32.xlu1 %v2950_v33, %s3082_s9 }
 0x4fe   : > { %v1756_v63 = vpop.f32.mrf.mxu1 }
 0x4ff   : > { %v1767_v1 = vmul.f32 %v2989_v0, %v1756_v63  ;;  %v2851_v63 = vld [vmem:[%s3283_s5 + $0x10] sm:$0xff]  ;;  %v2850_v0 = vld [vmem:[%s3283_s5 + $0x8] sm:$0xff] }
 0x500   : > { %2022 = vmatpush.bf16.msra.mxu1 %v2851_v63 }
 0x501   : > { %v1771_v5 = vsub.f32 %v3309_v30, %v1767_v1  ;;  %v2849_v1 = vld [vmem:[%s3283_s5] sm:$0xff]  ;;  %s3643_s5 = scalar_lea.vmem %s3233_s13, %s3252_s0  ;;  %s3648_s0 = smov (!%p2743_p5), %s3647_s7 }
 0x502   : > { %v2975_v17 = vld [vmem:[%s3643_s5] ss:$0 sm:$0xff] }
 0x503   : > { %v2967_v25 = vpop.permute.xlu2 %2966 }
 0x504   : > { %v2969_v26 = vunpack.i.h.bf16 %v2967_v25  ;;  %v2968_v27 = vunpack.i.l.bf16 %v2967_v25  ;;  %2023 = vmatpush.bf16.msra.mxu1 %v2850_v0 }
 0x506   : > { %v1758_v3 = vpop.f32.mrf.mxu1 }
 0x507   : > { %v1768_v4 = vmul.f32 %v2991_v2, %v1758_v3  ;;  %v2974_v3 = vld [vmem:[%s1064_s29] ss:$0 sm:$0xff]  ;;  %s3645_s29 = sld [smem:[#allocation16_spill]] (!%p2743_p5) }
 0x508   : > { %2024 = vmatpush.bf16.msra.mxu1 %v2849_v1 }
 0x509   : > { %v1772_v6 = vsub.f32 %v3311_v31, %v1768_v4 }
 0x50b   : > { %v2960_v7 = vpack.i.bf16 %v1772_v6, %v1771_v5 }
 0x50d   : > { %2961 = vrot.lane.b32.xlu1 %v2960_v7, %s3082_s9  ;;  %s3644_s9 = sld [smem:[#allocation14_spill]] (!%p2743_p5) }
 0x541   : > { %v1659_v13 = vpop.f32.mrf.mxu2 }
 0x549   : > { %v1661_v18 = vpop.f32.mrf.mxu2 }
 0x551   : > { %v1664_v40 = vpop.f32.mrf.mxu2 }
 0x559   : > { %v1666_v42 = vpop.f32.mrf.mxu2 }
 0x56f   : > { %v2952_v19 = vpop.permute.xlu1 %2951 }
 0x570   : > { %v2954_v22 = vunpack.i.h.bf16 %v2952_v19  ;;  %v2953_v23 = vunpack.i.l.bf16 %v2952_v19 }
 0x572   : > { %v1805_v36 = vsel %vm1371_vm5, %v1659_v13, %v2953_v23  ;;  %v1806_v37 = vsel %vm1371_vm5, %v1661_v18, %v2954_v22 }
 0x573   : > { %v1809_v38 = vsel %vm1643_vm7, %v1805_v36, %v2958_v21  ;;  %v1810_v24 = vsel %vm1643_vm7, %v1806_v37, %v2959_v20 }
 0x574   : > { %v1813_v39 = vpack.c.bf16 %v1810_v24, %v1809_v38 }
 0x576   : > { %1891 = vmatmul.bf16.vlgmr.msra.gmra.mxu2 %v1813_v39 }
 0x57f   : > { %v2962_v41 = vpop.permute.xlu1 %2961 }
 0x580   : > { %v2964_v28 = vunpack.i.h.bf16 %v2962_v41  ;;  %v2963_v29 = vunpack.i.l.bf16 %v2962_v41 }
 0x582   : > { %v1807_v43 = vsel %vm1371_vm5, %v1664_v40, %v2963_v29  ;;  %v1808_v48 = vsel %vm1371_vm5, %v1666_v42, %v2964_v28 }
 0x583   : > { %v1811_v49 = vsel %vm1643_vm7, %v1807_v43, %v2968_v27  ;;  %v1812_v50 = vsel %vm1643_vm7, %v1808_v48, %v2969_v26 }
 0x584   : > { %v1814_v44 = vpack.c.bf16 %v1812_v50, %v1811_v49 }
 0x586   : > { %1896 = vmatmul.bf16.gmra.mxu2 %v1814_v44 }
 0x5f9   : > { %v1892_v35 = vpop.f32.mrf.mxu2 }
 0x5fa   : > { %v1893_v53 = vadd.f32 %v2973_v52, %v1892_v35 }
 0x5fc   : > { %v1902_v56 = vmax.f32 %v1893_v53, 0.0 }
 0x601   : > { %v1894_v54 = vpop.f32.mrf.mxu2 }
 0x602   : > { %v1895_v55 = vadd.f32 %v2973_v52, %v1894_v54 }
 0x604   : > { %v1903_v57 = vmax.f32 %v1895_v55, 0.0 }
 0x606   : > { %v1906_v47 = vpack.c.bf16 %v1903_v57, %v1902_v56 }
 0x608   : > { %2723 = vmatmul.msk.bf16.vlgmr.msra.gmra.mxu3 %vm1371_vm5, %v1906_v47 }
 0x609   : > { %v1897_v46 = vpop.f32.mrf.mxu2 }
 0x60a   : > { %v1898_v58 = vadd.f32 %v2973_v52, %v1897_v46 }
 0x60c   : > { %v1904_v61 = vmax.f32 %v1898_v58, 0.0 }
 0x611   : > { %v1899_v59 = vpop.f32.mrf.mxu2 }
 0x612   : > { %v1900_v60 = vadd.f32 %v2973_v52, %v1899_v59 }
 0x614   : > { %v1905_v33 = vmax.f32 %v1900_v60, 0.0 }
 0x616   : > { %v1907_v62 = vpack.c.bf16 %v1905_v33, %v1904_v61 }
 0x618   : > { %2724 = vmatmul.msk.bf16.gmra.mxu3 %vm1371_vm5, %v1907_v62 }
 0x68b   : > { %v1959_v2 = vpop.f32.mrf.mxu3 }
 0x68c   : > { %v1960_v4 = vadd.f32 %v2974_v3, %v1959_v2 }
 0x68e   : > { %v1969_v7 = vmax.f32 %v1960_v4, 0.0 }
 0x693   : > { %v1961_v5 = vpop.f32.mrf.mxu3 }
 0x694   : > { %v1962_v6 = vadd.f32 %v2974_v3, %v1961_v5 }
 0x696   : > { %v1970_v8 = vmax.f32 %v1962_v6, 0.0 }
 0x698   : > { %v1973_v9 = vpack.c.bf16 %v1970_v8, %v1969_v7 }
 0x69a   : > { %2741 = vmatmul.msk.bf16.vlgmr.msra.gmra.mxu1 %vm1371_vm5, %v1973_v9 }
 0x69b   : > { %v1964_v10 = vpop.f32.mrf.mxu3 }
 0x69c   : > { %v1965_v11 = vadd.f32 %v2974_v3, %v1964_v10 }
 0x69e   : > { %v1971_v14 = vmax.f32 %v1965_v11, 0.0 }
 0x6a3   : > { %v1966_v12 = vpop.f32.mrf.mxu3 }
 0x6a4   : > { %v1967_v13 = vadd.f32 %v2974_v3, %v1966_v12 }
 0x6a6   : > { %v1972_v15 = vmax.f32 %v1967_v13, 0.0 }
 0x6a8   : > { %v1974_v16 = vpack.c.bf16 %v1972_v15, %v1971_v14 }
 0x6aa   : > { %2742 = vmatmul.msk.bf16.gmra.mxu1 %vm1371_vm5, %v1974_v16 }
 0x717   : > { %v2026_v18 = vpop.f32.mrf.mxu1 }
 0x718   : > { %v2027_v19 = vadd.f32 %v2975_v17, %v2026_v18 }
 0x71a   : > { %v2036_v20 = vadd.f32 %v2027_v19, %v3313_v32 }
 0x71c   : > { %2040 = vst.msk [vmem:[#allocation2] sm:$0xff] %vm1253_vm4, %v2036_v20 }
 0x71f   : > { %v2028_v21 = vpop.f32.mrf.mxu1 }
 0x720   : > { %v2029_v22 = vadd.f32 %v2975_v17, %v2028_v21 }
 0x722   : > { %v2037_v23 = vadd.f32 %v2029_v22, %v3319_v34 }
 0x724   : > { %2041 = vst.msk [vmem:[#allocation2 + $0x8] sm:$0xff] %vm1253_vm4, %v2037_v23 }
 0x727   : > { %v2031_v36 = vpop.f32.mrf.mxu1 }
 0x728   : > { %v2032_v37 = vadd.f32 %v2975_v17, %v2031_v36 }
 0x72a   : > { %v2038_v38 = vadd.f32 %v2032_v37, %v3309_v30 }
 0x72c   : > { %2042 = vst.msk [vmem:[#allocation2 + $0x10] sm:$0xff] %vm1253_vm4, %v2038_v38 }
 0x72f   : > { %v2033_v24 = vpop.f32.mrf.mxu1 }
 0x730   : > { %v2034_v39 = vadd.f32 %v2975_v17, %v2033_v24  ;;  %2047 = sbr.rel (%p2743_p5) target bundleno = 2456 (0x998), region = 144 }
 0x732   : > { %v2039_v40 = vadd.f32 %v2034_v39, %v3311_v31 }
 0x734   : > { %2043 = vst.msk [vmem:[#allocation2 + $0x18] sm:$0xff] %vm1253_vm4, %v2039_v40 }
 0x735   : > { %v2854_v32 = vld [vmem:[%s3644_s9 + $0x8] sm:$0xff]  ;;  %v2853_v25 = vld [vmem:[%s3644_s9] sm:$0xff]  ;;  %v2048_v41 = vpack.c.bf16 %v2037_v23, %v2036_v20  ;;  %v2049_v31 = vpack.c.bf16 %v2039_v40, %v2038_v38  ;;  %v2860_v60 = vld [vmem:[%s3647_s7 + $0x18] sm:$0xff] }
 0x736   : > { %v2856_v34 = vld [vmem:[%s3645_s29 + $0x8] sm:$0xff]  ;;  %v2855_v30 = vld [vmem:[%s3645_s29] sm:$0xff]  ;;  %2082 = vmatpush.bf16.msra.mxu0 %v2854_v32  ;;  %2277 = vmatpush.bf16.msra.mxu3 %v2860_v60  ;;  %v2859_v1 = vld [vmem:[%s3648_s0 + $0x10] sm:$0xff] }
 0x737   : > { %2197 = vmatpush.bf16.msra.mxu1 %v2856_v34  ;;  %v2992_v27 = vld [vmem:[%s3646_s8] ss:$0 sm:$0xff]  ;;  %v2858_v7 = vld [vmem:[%s3648_s0 + $0x8] sm:$0xff] }
 0x738   : > { %v2993_v19 = vld [vmem:[%s3649_s26] ss:$0 sm:$0xff] }
 0x73a   : > { %2083 = vmatpush.bf16.msra.mxu0 %v2853_v25  ;;  %2278 = vmatpush.bf16.msra.mxu3 %v2859_v1 }
 0x73b   : > { %2198 = vmatpush.bf16.msra.mxu1 %v2855_v30 }
 0x73d   : > { %2752 = vmatmul.msk.bf16.vlgmr.msra.gmra.mxu0 %vm1253_vm4, %v2048_v41 }
 0x73e   : > { %2766 = vmatmul.msk.bf16.vlgmr.msra.gmra.mxu1 %vm1253_vm4, %v2048_v41  ;;  %2279 = vmatpush.bf16.msra.mxu3 %v2858_v7 }
 0x74d   : > { %2753 = vmatmul.msk.bf16.gmra.mxu0 %vm1253_vm4, %v2049_v31 }
 0x74e   : > { %2767 = vmatmul.msk.bf16.gmra.mxu1 %vm1253_vm4, %v2049_v31 }
 0x7ba   : > { %v2085_v26 = vpop.f32.mrf.mxu0 }
 0x7bb   : > { %v2086_v28 = vadd.f32 %v2992_v27, %v2085_v26  ;;  %v3517_v35 = vpop.f32.mrf.mxu1 }
 0x7bd   : > { %v2754_v43 = vmul.f32 -1.442695, %v2086_v28 }
 0x7c2   : > { %v2087_v29 = vpop.f32.mrf.mxu0 }
 0x7c3   : > { %v2088_v42 = vadd.f32 %v2992_v27, %v2087_v29  ;;  %v3525_v46 = vpop.f32.mrf.mxu1 }
 0x7c5   : > { %v2755_v48 = vmul.f32 -1.442695, %v2088_v42 }
 0x7c7   : > { %2996 = vpow2.f32 %v2755_v48 }
 0x7c8   : > { %2998 = vpow2.f32 %v2754_v43 }
 0x7ca   : > { %v2090_v49 = vpop.f32.mrf.mxu0 }
 0x7cb   : > { %v2091_v50 = vadd.f32 %v2992_v27, %v2090_v49  ;;  %v2205_v6 = vpop.f32.mrf.mxu1  ;;  %v2201_v49 = vadd.f32 %v2993_v19, %v3517_v35  ;;  %v2214_v35 = vld [vmem:[%s3656_s28] sm:$0x3] }
 0x7cc   : > { %v2206_v32 = vadd.f32 %v2993_v19, %v2205_v6 }
 0x7cd   : > { %v2997_v44 = vpop.eup %2996  ;;  %v2756_v45 = vmul.f32 -1.442695, %v2091_v50 }
 0x7ce   : > { %v2999_v51 = vpop.eup %2998  ;;  %v3519_v52 = vadd.f32 1.0, %v2997_v44 }
 0x7cf   : > { %3000 = vpow2.f32 %v2756_v45  ;;  %v3521_v53 = vadd.f32 1.0, %v2999_v51  ;;  %v2203_v45 = vadd.f32 %v2993_v19, %v3525_v46  ;;  %v2863_v46 = vld [vmem:[%s3657_s2 + $0x10] sm:$0xff] }
 0x7d0   : > { %3002 = vrcp.f32 %v3519_v52  ;;  %vm2131_vm11 = vweird.f32 %v3519_v52  ;;  %v2135_v20 = vand.u32 2147483647, %v3519_v52  ;;  %v2137_v21 = vand.u32 2147483648, %v3519_v52 }
 0x7d1   : > { %3004 = vrcp.f32 %v3521_v53  ;;  %vm2116_vm8 = vweird.f32 %v3521_v53  ;;  %v2120_v24 = vand.u32 2147483647, %v3521_v53  ;;  %v2122_v39 = vand.u32 2147483648, %v3521_v53 }
 0x7d2   : > { %v2092_v54 = vpop.f32.mrf.mxu0  ;;  %vm2136_vm6 = vcmp.eq.f32.partialorder %v2135_v20, 8.507059e+37  ;;  %v2138_v26 = vor.u32 1.1754944e-38, %v2137_v21 }
 0x7d3   : > { %v2093_v55 = vadd.f32 %v2992_v27, %v2092_v54  ;;  %v2207_v34 = vpop.f32.mrf.mxu1  ;;  %v2123_v48 = vor.u32 1.1754944e-38, %v2122_v39 }
 0x7d4   : > { %v2208_v42 = vadd.f32 %v2993_v19, %v2207_v34 }
 0x7d5   : > { %v3001_v56 = vpop.eup %3000  ;;  %v2757_v57 = vmul.f32 -1.442695, %v2093_v55 }
 0x7d6   : > { %v2109_v47 = vadd.f32 1.0, %v3001_v56  ;;  %v3527_v58 = vpop.eup %3002 }
 0x7d7   : > { %3006 = vpow2.f32 %v2757_v57  ;;  %v3529_v59 = vpop.eup %3004  ;;  %v2127_v33 = vmul.f32 %v3527_v58, %v3519_v52  ;;  %vm2132_vm12 = vweird.f32 %v3527_v58 }
 0x7d8   : > { %3008 = vrcp.f32 %v2109_v47  ;;  %v2112_v63 = vmul.f32 %v3529_v59, %v3521_v53  ;;  %vm2117_vm10 = vweird.f32 %v3529_v59  ;;  %v2152_v14 = vand.u32 2147483648, %v2109_v47  ;;  %vm3561_vm0 = vmor %vm2131_vm11, %vm2132_vm12 }
 0x7d9   : > { %v2128_v3 = vsub.f32 1.0, %v2127_v33  ;;  %vm2146_vm13 = vweird.f32 %v2109_v47  ;;  %v2150_v16 = vand.u32 2147483647, %v2109_v47  ;;  %vm3569_vm1 = vmor %vm2116_vm8, %vm2117_vm10 }
 0x7da   : > { %v2113_v5 = vsub.f32 1.0, %v2112_v63  ;;  %v2153_v25 = vor.u32 1.1754944e-38, %v2152_v14  ;;  %v2994_v63 = vld [vmem:[%s3658_s16] ss:$0 sm:$0xff] }
 0x7db   : > { %v2129_v9 = vmul.f32 %v3527_v58, %v2128_v3  ;;  %vm2151_vm2 = vcmp.eq.f32.partialorder %v2150_v16, 8.507059e+37 }
 0x7dc   : > { %v2114_v11 = vmul.f32 %v3529_v59, %v2113_v5  ;;  %v2995_v5 = vld [vmem:[%s3659_s15] ss:$0 sm:$0xff] }
 0x7dd   : > { %v3007_v61 = vpop.eup %3006  ;;  %v2130_v15 = vadd.f32 %v3527_v58, %v2129_v9 }
 0x7de   : > { %v3009_v62 = vpop.eup %3008  ;;  %v2110_v0 = vadd.f32 1.0, %v3007_v61  ;;  %v2115_v18 = vadd.f32 %v3529_v59, %v2114_v11 }
 0x7df   : > { %v2142_v2 = vmul.f32 %v3009_v62, %v2109_v47  ;;  %vm2147_vm9 = vweird.f32 %v3009_v62  ;;  %v2134_v41 = vsel %vm3561_vm0, %v3527_v58, %v2130_v15  ;;  %v2857_v47 = vld [vmem:[%s3648_s0] sm:$0xff]  ;;  %v2864_v58 = vld [vmem:[%s3657_s2 + $0x18] sm:$0xff] }
 0x7e0   : > { %3010 = vrcp.f32 %v2110_v0  ;;  %vm3549_vm14 = vmor %vm2146_vm13, %vm2147_vm9  ;;  %v2167_v23 = vand.u32 2147483648, %v2110_v0  ;;  %v2165_v38 = vand.u32 2147483647, %v2110_v0  ;;  %vm2161_vm3 = vweird.f32 %v2110_v0  ;;  %2280 = vmatpush.bf16.msra.mxu3 %v2857_v47 }
 0x7e1   : > { %v2143_v4 = vsub.f32 1.0, %v2142_v2  ;;  %v2119_v29 = vsel %vm3569_vm1, %v3529_v59, %v2115_v18  ;;  %v2139_v50 = vsel %vm2136_vm6, %v2138_v26, %v2134_v41  ;;  %vm2121_vm9 = vcmp.eq.f32.partialorder %v2120_v24, 8.507059e+37  ;;  %v2862_v59 = vld [vmem:[%s3657_s2 + $0x8] sm:$0xff] }
 0x7e2   : > { %v2168_v28 = vor.u32 1.1754944e-38, %v2167_v23  ;;  %vm2166_vm8 = vcmp.eq.f32.partialorder %v2165_v38, 8.507059e+37  ;;  %v2124_v53 = vsel %vm2121_vm9, %v2123_v48, %v2119_v29  ;;  %v2211_v54 = vmul.f32 %v2203_v45, %v2139_v50 }
 0x7e3   : > { %v2144_v8 = vmul.f32 %v3009_v62, %v2143_v4  ;;  %v2210_v56 = vmul.f32 %v2201_v49, %v2124_v53 }
 0x7e5   : > { %v2145_v12 = vadd.f32 %v3009_v62, %v2144_v8  ;;  %v2215_v57 = vpack.c.bf16 %v2211_v54, %v2210_v56 }
 0x7e6   : > { %v3011_v10 = vpop.eup %3010 }
 0x7e7   : > { %v2157_v13 = vmul.f32 %v3011_v10, %v2110_v0  ;;  %v2149_v36 = vsel %vm3549_vm14, %v3009_v62, %v2145_v12  ;;  %vm2162_vm15 = vweird.f32 %v3011_v10  ;;  %v2861_v62 = vld [vmem:[%s3657_s2] sm:$0xff] }
 0x7e8   : > { %v2154_v27 = vsel %vm2151_vm2, %v2153_v25, %v2149_v36  ;;  %vm2163_vm7 = vmor %vm2161_vm3, %vm2162_vm15 }
 0x7e9   : > { %v2158_v17 = vsub.f32 1.0, %v2157_v13  ;;  %v2212_v51 = vmul.f32 %v2206_v32, %v2154_v27 }
 0x7eb   : > { %v2159_v37 = vmul.f32 %v3011_v10, %v2158_v17 }
 0x7ed   : > { %v2160_v31 = vadd.f32 %v3011_v10, %v2159_v37 }
 0x7ef   : > { %v2164_v43 = vsel %vm2163_vm7, %v3011_v10, %v2160_v31 }
 0x7f0   : > { %v2169_v44 = vsel %vm2166_vm8, %v2168_v28, %v2164_v43 }
 0x7f1   : > { %v2213_v52 = vmul.f32 %v2208_v42, %v2169_v44 }
 0x7f3   : > { %v2216_v55 = vpack.c.bf16 %v2213_v52, %v2212_v51 }
 0x7f5   : > { %2226 = vmatpush.bf16.msra.mxu2 %v2216_v55 }
 0x7f9   : > { %2227 = vmatpush.bf16.msra.mxu2 %v2215_v57 }
 0x7fc   : > { %2768 = vmatmul.msk.bf16.vlgmr.msra.gmra.mxu2 %vm1253_vm4, %v2214_v35  ;;  %vm2340_vm4 = vcmask 519168  }
 0x7fd   : > { %2331 = vmatpush.bf16.msrb.mxu2 %v2864_v58 }
 0x801   : > { %2332 = vmatpush.bf16.msrb.mxu2 %v2863_v46 }
 0x805   : > { %2333 = vmatpush.bf16.msrb.mxu2 %v2862_v59 }
 0x809   : > { %2334 = vmatpush.bf16.msrb.mxu2 %v2861_v62 }
 0x87f   : > { %v2229_v60 = vpop.f32.mrf.mxu2 }
 0x880   : > { %v2233_v61 = vpack.c.bf16 %v2229_v60, %v2229_v60 }
 0x882   : > { %2785 = vmatmul.msk.bf16.vlgmr.msra.gmra.mxu3 %vm1371_vm5, %v2233_v61 }
 0x887   : > { %v2231_v33 = vpop.f32.mrf.mxu2 }
 0x905   : > { %v2282_v0 = vpop.f32.mrf.mxu3 }
 0x906   : > { %v2283_v1 = vadd.f32 %v2994_v63, %v2282_v0 }
 0x908   : > { %v2286_v2 = vmax.f32 %v2283_v1, 0.0 }
 0x90a   : > { %v2287_v3 = vpack.c.bf16 %v2286_v2, %v2286_v2 }
 0x90c   : > { %2802 = vmatmul.msk.bf16.vlgmr.msrb.gmra.mxu2 %vm1371_vm5, %v2287_v3 }
 0x90d   : > { %v2284_v4 = vpop.f32.mrf.mxu3 }
 0x98f   : > { %v2336_v6 = vpop.f32.mrf.mxu2 }
 0x990   : > { %v2337_v7 = vadd.f32 %v2995_v5, %v2336_v6 }
 0x992   : > { %2341 = vst.msk [vmem:[#allocation4] sm:$0xf] %vm2340_vm4, %v2337_v7 }
 0x997   : > { %v2338_v8 = vpop.f32.mrf.mxu2 }
 0x998 PF: > { %s3660_s23 = sld [smem:[#allocation22_spill]]  ;;  %p2874_p6 = scmp.eq.s32.totalorder %s3246_s10, 1 }
 0x999   : > { %s3084_s5 = smov [#allocation4]  }
 0x99a   : > { %s2348_s8 = sshll.u32 %s3084_s5, 4  ;;  %s2349_s8 = int_to_ptr.vmem [resolvable:$true] %s2348_s8 }
 0x99e   : > { %s2350_s7 = sshll.u32 %s3660_s23, 4  ;;  %s3032_s16 = scalar_lea.hbm %s3660_s23, 4  ;;  %s2351_s7 = int_to_ptr.hbm [resolvable:$true] %s2350_s7 }
 0x99f   : > { %s3026_s26 = sshra.s32 %s2351_s7, 4  ;;  %s3027_s26 = int_to_ptr.hbm [resolvable:$true] %s3026_s26 }
 0x9a0   : > { %s3028_s28 = scalar_lea.hbm %s3027_s26, 4  ;;  %p3033_p10 = scmp.lt.s32.totalorder %s3027_s26, %s3660_s23 }
 0x9a1   : > { %p3029_p7 = scmp.ne.s32.totalorder %s3027_s26, %s3028_s28  ;;  %p3034_p11 = scmp.lt.s32.totalorder %s3032_s16, %s3028_s28 }
 0x9a3   : > { %p3030_p8 = pnand %p3029_p7, %p2874_p6  ;;  %p3035_p12 = por %p3034_p11, %p3033_p10 }
 0x9a5   : > { %p3031_p9 = pneg %p3030_p8 }
 0x9a7   : > { %p3036_p13 = pnand %p3035_p12, %p3031_p9 }
 0x9a9   : > { %3039 = shalt.err (!%p3036_p13)
}
 0x9aa   : > { %2871 = dma.vmem_to_hbm [thread:$0]  (%p2874_p6), %s2349_s8, 64, %s2351_s7, [#allocation5]  }
 0x9ab   : > { %3045 = dma.done.wait (%p2874_p6), [#allocation5], 64  }
 0x9ac   : > { %3047 = vsyncadd (%p2874_p6), [#allocation5], 4294967232 }
 0x9ad PF: > { %s3661_s15 = sld [smem:[#allocation23_spill]] }
 0x9b3   : > { %s70_s7 = sadd.s32 1, %s3661_s15  }
 0x9b4   : > { %p67_p0 = scmp.ge.s32.totalorder %s70_s7, 4  }
 0x9b6   :  { %69 = sbr.rel (!%p67_p0) target bundleno = 53 (0x35), region = 233 }
 0x9bb   :  { %2364 = vsyncpa [#allocation5], 1 }
 0x9bc   :  { %2366 = vsyncpa [#allocation5 + $0x1], 1 }

</bundles_post_ra>
